<compile_context>
chip_gen: v7x
topology: tpu7x:2x2x1
jax: 0.10.0
libtpu: 0.0.40
codegen_flags: <defaults>
</compile_context>

<pallas_src>
import math
import functools

import numpy as np
import jax
import jax.numpy as jnp
from jax.experimental import pallas as pl
from jax.experimental.pallas import tpu as pltpu


# ----------------------------------------------------------------------------
# Synthetic wiring (mimics the kerasncp Wiring interface used by WiredCfC).
# ----------------------------------------------------------------------------
class SyntheticWiring:
    def __init__(self, input_dim=4, layer_sizes=(8, 6, 4), seed=0):
        self.input_dim = input_dim
        self._layer_sizes = list(layer_sizes)
        self.units = int(sum(layer_sizes))
        self.output_dim = int(layer_sizes[-1])
        rng = np.random.default_rng(seed)
        self.sensory_adjacency_matrix = rng.choice(
            [-1.0, 0.0, 1.0], size=(input_dim, self.units)).astype(np.float32)
        self.adjacency_matrix = rng.choice(
            [-1.0, 0.0, 1.0], size=(self.units, self.units)).astype(np.float32)
        offsets = np.cumsum([0] + self._layer_sizes)
        self._neurons = [list(range(int(offsets[i]), int(offsets[i + 1])))
                         for i in range(len(layer_sizes))]

    @property
    def num_layers(self):
        return len(self._layer_sizes)

    def get_neurons_of_layer(self, l):
        return self._neurons[l]

    def is_built(self):
        return True


# ----------------------------------------------------------------------------
# Fused Pallas kernel: the whole (T x layers) recurrence.
#   grid = (T,), sequential ("arbitrary").
#   x_ref   : (1, Bp, HP)      padded input for this timestep
#   ts_ref  : (1, Bp, HP)      per-sample elapsed time, broadcast over hidden
#   w_in_ref: (L, HP, 4*HP)    input->gates weights (ff1|ff2|time_a|time_b)
#   w_h_ref : (L, HP, 4*HP)    hidden->gates weights
#   b_ref   : (L, Bp, 4*HP)    gate biases (broadcast over batch rows)
#   o_ref   : (1, Bp, HP)      last-layer hidden for this timestep
#   h_ref   : (L, Bp, HP)      VMEM scratch hidden states, persists over grid
# ----------------------------------------------------------------------------
def _wired_cfc_kernel(x_ref, ts_ref, w_in_ref, w_h_ref, b_ref, o_ref, h_ref,
                      *, num_layers, hp):
    t = pl.program_id(0)

    @pl.when(t == 0)
    def _init():
        h_ref[...] = jnp.zeros_like(h_ref)

    x_in = x_ref[0]          # (Bp, HP)
    ts = ts_ref[0]           # (Bp, HP)

    for l in range(num_layers):          # static unroll over layers
        h = h_ref[l]                     # (Bp, HP)
        z = (jnp.dot(x_in, w_in_ref[l], preferred_element_type=jnp.float32)
             + jnp.dot(h, w_h_ref[l], preferred_element_type=jnp.float32)
             + b_ref[l])                 # (Bp, 4*HP) -- single fused gate matmul
        ff1 = jnp.tanh(z[:, 0 * hp:1 * hp])
        ff2 = jnp.tanh(z[:, 1 * hp:2 * hp])
        t_a = z[:, 2 * hp:3 * hp]
        t_b = z[:, 3 * hp:4 * hp]
        t_interp = jax.nn.sigmoid(t_a * ts + t_b)
        h_new = ff1 * (1.0 - t_interp) + t_interp * ff2
        h_ref[l] = h_new
        x_in = h_new                     # feeds the next layer

    o_ref[0] = x_in                      # last layer's hidden state


def wired_cfc_forward_pallas(x, timespans, w_in, w_h, bias, *, layer_sizes, hp):
    """x: (B, T, F) f32; timespans: (B, T) f32.  Returns (B, T, motor_size)."""
    B, T, F = x.shape
    L = len(layer_sizes)
    bp = ((B + 7) // 8) * 8                      # batch padded to sublane multiple

    # Padded, time-major input slab (T, Bp, HP); zero padding keeps results exact
    # because padded weight rows/cols and padded biases are zero.
    xp = jnp.zeros((T, bp, hp), jnp.float32)
    xp = xp.at[:, :B, :F].set(jnp.transpose(x, (1, 0, 2)).astype(jnp.float32))

    # Per-sample elapsed time, broadcast over the hidden dim (fixes the old
    # (1, B) broadcasting bug).
    tsp = jnp.ones((T, bp, hp), jnp.float32)
    tsp = tsp.at[:, :B, :].set(
        jnp.broadcast_to(
            jnp.transpose(timespans, (1, 0)).astype(jnp.float32)[:, :, None],
            (T, B, hp)))

    bias_b = jnp.broadcast_to(bias, (L, bp, 4 * hp))

    kernel = functools.partial(_wired_cfc_kernel, num_layers=L, hp=hp)
    out = pl.pallas_call(
        kernel,
        out_shape=jax.ShapeDtypeStruct((T, bp, hp), jnp.float32),
        grid_spec=pltpu.PrefetchScalarGridSpec(
            num_scalar_prefetch=0,
            grid=(T,),
            in_specs=[
                pl.BlockSpec((1, bp, hp), lambda t: (t, 0, 0)),        # x_t
                pl.BlockSpec((1, bp, hp), lambda t: (t, 0, 0)),        # ts_t
                pl.BlockSpec((L, hp, 4 * hp), lambda t: (0, 0, 0)),    # W_in (VMEM-resident)
                pl.BlockSpec((L, hp, 4 * hp), lambda t: (0, 0, 0)),    # W_h  (VMEM-resident)
                pl.BlockSpec((L, bp, 4 * hp), lambda t: (0, 0, 0)),    # bias (VMEM-resident)
            ],
            out_specs=pl.BlockSpec((1, bp, hp), lambda t: (t, 0, 0)),
            scratch_shapes=[pltpu.VMEM((L, bp, hp), jnp.float32)],     # hidden states
        ),
        compiler_params=pltpu.CompilerParams(
            dimension_semantics=("arbitrary",)),                       # sequential recurrence
    )(xp, tsp, w_in, w_h, bias_b)

    motor = layer_sizes[-1]
    return jnp.transpose(out[:, :B, :motor], (1, 0, 2))                # (B, T, motor)


# ----------------------------------------------------------------------------
# Parameter construction (mirrors CfCCell.__init__/init_weights, torch layout).
# ----------------------------------------------------------------------------
def _xavier_uniform(key, out_dim, in_dim):
    limit = math.sqrt(6.0 / (in_dim + out_dim))
    return jax.random.uniform(key, (out_dim, in_dim), jnp.float32, -limit, limit)


def _bias_init(key, out_dim, in_dim):
    bound = 1.0 / math.sqrt(in_dim)
    return jax.random.uniform(key, (out_dim,), jnp.float32, -bound, bound)


def build_real_params(wiring, key):
    """Per-layer unpadded weights (torch (out, in) layout); ff1/ff2 pre-masked."""
    params, layer_sizes = [], []
    in_features = wiring.input_dim
    for l in range(wiring.num_layers):
        hidden_units = wiring.get_neurons_of_layer(l)
        H = len(hidden_units)
        layer_sizes.append(H)
        if l == 0:
            input_sparsity = wiring.sensory_adjacency_matrix[:, hidden_units]
        else:
            prev = wiring.get_neurons_of_layer(l - 1)
            input_sparsity = wiring.adjacency_matrix[:, hidden_units]
            input_sparsity = input_sparsity[prev, :]
        sparsity = np.concatenate(
            [input_sparsity, np.ones((H, H), dtype=np.float32)], axis=0)  # (C, H)
        mask = jnp.asarray(np.abs(sparsity.T).astype(np.float32))          # (H, C)
        C = in_features + H

        keys = jax.random.split(key, 9)
        key = keys[0]
        params.append(dict(
            in_features=in_features, hidden=H,
            w_ff1=_xavier_uniform(keys[1], H, C) * mask,   # masked
            w_ff2=_xavier_uniform(keys[2], H, C) * mask,   # masked
            w_ta=_xavier_uniform(keys[3], H, C),           # time_a NOT masked
            w_tb=_xavier_uniform(keys[4], H, C),           # time_b NOT masked
            b_ff1=_bias_init(keys[5], H, C),
            b_ff2=_bias_init(keys[6], H, C),
            b_ta=_bias_init(keys[7], H, C),
            b_tb=_bias_init(keys[8], H, C),
        ))
        in_features = H
    return params, layer_sizes


def pack_params(params, hp):
    """Pack/pad per-layer gate weights into lane-dense stacks:
       W_in (L, HP, 4*HP), W_h (L, HP, 4*HP), bias (L, 1, 4*HP)."""
    L = len(params)
    w_in = np.zeros((L, hp, 4 * hp), np.float32)
    w_h = np.zeros((L, hp, 4 * hp), np.float32)
    bias = np.zeros((L, 1, 4 * hp), np.float32)
    for l, p in enumerate(params):
        I, H = p['in_features'], p['hidden']
        assert I <= hp and H <= hp
        gates = [(p['w_ff1'], p['b_ff1']), (p['w_ff2'], p['b_ff2']),
                 (p['w_ta'], p['b_ta']), (p['w_tb'], p['b_tb'])]
        for k, (wg, bg) in enumerate(gates):
            wg = np.asarray(wg)                                   # (H, I + H)
            w_in[l, :I, k * hp:k * hp + H] = wg[:, :I].T
            w_h[l, :H, k * hp:k * hp + H] = wg[:, I:].T
            bias[l, 0, k * hp:k * hp + H] = np.asarray(bg)
    return jnp.asarray(w_in), jnp.asarray(w_h), jnp.asarray(bias)


# ----------------------------------------------------------------------------
# Pure-JAX reference (unpadded, explicit concat -- mirrors the torch forward).
# ----------------------------------------------------------------------------
def wired_cfc_forward_ref(x, timespans, *, params, layer_sizes):
    B, T, _ = x.shape
    h_states = [jnp.zeros((B, H), jnp.float32) for H in layer_sizes]
    outputs = []
    for t in range(T):
        inputs = x[:, t]
        ts = timespans[:, t][:, None]          # (B, 1): broadcasts over hidden dim
        for i, p in enumerate(params):
            xc = jnp.concatenate([inputs, h_states[i]], axis=1)
            ff1 = jnp.tanh(xc @ p['w_ff1'].T + p['b_ff1'])
            ff2 = jnp.tanh(xc @ p['w_ff2'].T + p['b_ff2'])
            t_a = xc @ p['w_ta'].T + p['b_ta']
            t_b = xc @ p['w_tb'].T + p['b_tb']
            t_interp = jax.nn.sigmoid(t_a * ts + t_b)
            h = ff1 * (1.0 - t_interp) + t_interp * ff2
            inputs = h
            h_states[i] = h
        outputs.append(h_states[-1])
    return jnp.stack(outputs, axis=1)          # (B, T, motor_size)


if __name__ == "__main__":
    key = jax.random.PRNGKey(0)
    k_param, k_x, k_ts = jax.random.split(key, 3)

    wiring = SyntheticWiring(input_dim=4, layer_sizes=(8, 6, 4), seed=0)
    real_params, layer_sizes = build_real_params(wiring, k_param)

    # HP: padded hidden/input width (lane-dense). At production sizes this would
    # track the real widths; here everything rounds up to one 128-lane tile.
    HP = 128 * int(np.ceil(max(max(layer_sizes), wiring.input_dim) / 128))
    w_in, w_h, bias = pack_params(real_params, HP)

    B, T = 2, 8
    x = jax.random.normal(k_x, (B, T, wiring.input_dim), dtype=jnp.float32)
    rand_ts = jax.random.uniform(k_ts, (B, T), jnp.float32, 0.5, 1.5)
    ones_ts = jnp.ones((B, T), jnp.float32)     # == timespans=None default

    fwd = jax.jit(functools.partial(wired_cfc_forward_pallas,
                                    layer_sizes=tuple(layer_sizes), hp=HP))
    ref = jax.jit(functools.partial(wired_cfc_forward_ref,
                                    params=real_params,
                                    layer_sizes=tuple(layer_sizes)))

    # default elapsed time (ts = 1.0)
    out0 = jax.block_until_ready(fwd(x, ones_ts, w_in, w_h, bias))
    ref0 = jax.block_until_ready(ref(x, ones_ts))
    assert out0.shape == (B, T, wiring.output_dim)
    np.testing.assert_allclose(np.asarray(out0), np.asarray(ref0),
                               rtol=5e-3, atol=5e-3)

    # per-sample elapsed times (exercises the fixed (B, 1) broadcast)
    out1 = jax.block_until_ready(fwd(x, rand_ts, w_in, w_h, bias))
    ref1 = jax.block_until_ready(ref(x, rand_ts))
    np.testing.assert_allclose(np.asarray(out1), np.asarray(ref1),
                               rtol=5e-3, atol=5e-3)

    print("KERNEL_OK")
</pallas_src>

<mosaic_0001>
module attributes {stable_mosaic.version = 11 : i64} {
  func.func @_wired_cfc_kernel(%arg0: i32, %arg1: memref<1x8x128xf32, #tpu.memory_space<vmem>>, %arg2: memref<1x8x128xf32, #tpu.memory_space<vmem>>, %arg3: memref<3x128x512xf32, #tpu.memory_space<vmem>>, %arg4: memref<3x128x512xf32, #tpu.memory_space<vmem>>, %arg5: memref<3x8x512xf32, #tpu.memory_space<vmem>>, %arg6: memref<1x8x128xf32, #tpu.memory_space<vmem>>, %arg7: memref<3x8x128xf32, #tpu.memory_space<vmem>>) attributes {dimension_semantics = [#tpu.dimension_semantics<arbitrary>], iteration_bounds = array<i64: 8>, scalar_prefetch = 0 : i64, scratch_operands = 1 : i64, tpu.core_type = #tpu.core_type<tc>, window_params = [{transform_indices = @transform_0, window_bounds = array<i64: 1, 8, 128>}, {transform_indices = @transform_1, window_bounds = array<i64: 1, 8, 128>}, {pipeline_mode = #tpu.pipeline_mode<synchronous>, transform_indices = @transform_2, window_bounds = array<i64: 3, 128, 512>}, {pipeline_mode = #tpu.pipeline_mode<synchronous>, transform_indices = @transform_3, window_bounds = array<i64: 3, 128, 512>}, {pipeline_mode = #tpu.pipeline_mode<synchronous>, transform_indices = @transform_4, window_bounds = array<i64: 3, 8, 512>}, {transform_indices = @transform_5, window_bounds = array<i64: 1, 8, 128>}]} {
    %c0_i32 = arith.constant 0 : i32
    %0 = arith.cmpi eq, %arg0, %c0_i32 : i32
    %1 = arith.extui %0 : i1 to i32
    %c0_i32_0 = arith.constant 0 : i32
    %2 = arith.cmpi ne, %1, %c0_i32_0 : i32
    scf.if %2 {
      %cst_63 = arith.constant 0.000000e+00 : f32
      %109 = vector.broadcast %cst_63 : f32 to vector<3x8x128xf32>
      %c0_64 = arith.constant 0 : index
      %c0_65 = arith.constant 0 : index
      %c0_66 = arith.constant 0 : index
      %110 = vector.load %arg7[%c0_64, %c0_65, %c0_66] : memref<3x8x128xf32, #tpu.memory_space<vmem>>, vector<3x8x128xf32>
      tpu.vector_store %arg7[%c0_64, %c0_65, %c0_66], %109 {strides = array<i32>} : memref<3x8x128xf32, #tpu.memory_space<vmem>>, vector<3x8x128xf32>,
    } else {
    }
    %c0 = arith.constant 0 : index
    %c0_1 = arith.constant 0 : index
    %c0_2 = arith.constant 0 : index
    %3 = vector.load %arg1[%c0, %c0_1, %c0_2] : memref<1x8x128xf32, #tpu.memory_space<vmem>>, vector<1x8x128xf32>
    %4 = vector.shape_cast %3 : vector<1x8x128xf32> to vector<8x128xf32>
    %c0_3 = arith.constant 0 : index
    %c0_4 = arith.constant 0 : index
    %c0_5 = arith.constant 0 : index
    %5 = vector.load %arg2[%c0_3, %c0_4, %c0_5] : memref<1x8x128xf32, #tpu.memory_space<vmem>>, vector<1x8x128xf32>
    %6 = vector.shape_cast %5 : vector<1x8x128xf32> to vector<8x128xf32>
    %c0_6 = arith.constant 0 : index
    %c0_7 = arith.constant 0 : index
    %c0_8 = arith.constant 0 : index
    %7 = vector.load %arg7[%c0_6, %c0_7, %c0_8] : memref<3x8x128xf32, #tpu.memory_space<vmem>>, vector<1x8x128xf32>
    %8 = vector.shape_cast %7 : vector<1x8x128xf32> to vector<8x128xf32>
    %c0_9 = arith.constant 0 : index
    %c0_10 = arith.constant 0 : index
    %c0_11 = arith.constant 0 : index
    %9 = vector.load %arg3[%c0_9, %c0_10, %c0_11] : memref<3x128x512xf32, #tpu.memory_space<vmem>>, vector<1x128x512xf32>
    %10 = vector.shape_cast %9 : vector<1x128x512xf32> to vector<128x512xf32>
    %cst = arith.constant dense<0.000000e+00> : vector<8x512xf32>
    %11 = tpu.matmul %4, %10, %cst {dimension_numbers = #tpu.dot_dimension_numbers<[1], [0], [0], [1], [0, 0, 1, 1], [], []>} : vector<8x128xf32>, vector<128x512xf32>, vector<8x512xf32> -> vector<8x512xf32>
    %c0_12 = arith.constant 0 : index
    %c0_13 = arith.constant 0 : index
    %c0_14 = arith.constant 0 : index
    %12 = vector.load %arg4[%c0_12, %c0_13, %c0_14] : memref<3x128x512xf32, #tpu.memory_space<vmem>>, vector<1x128x512xf32>
    %13 = vector.shape_cast %12 : vector<1x128x512xf32> to vector<128x512xf32>
    %cst_15 = arith.constant dense<0.000000e+00> : vector<8x512xf32>
    %14 = tpu.matmul %8, %13, %cst_15 {dimension_numbers = #tpu.dot_dimension_numbers<[1], [0], [0], [1], [0, 0, 1, 1], [], []>} : vector<8x128xf32>, vector<128x512xf32>, vector<8x512xf32> -> vector<8x512xf32>
    %15 = arith.addf %11, %14 : vector<8x512xf32>
    %c0_16 = arith.constant 0 : index
    %c0_17 = arith.constant 0 : index
    %c0_18 = arith.constant 0 : index
    %16 = vector.load %arg5[%c0_16, %c0_17, %c0_18] : memref<3x8x512xf32, #tpu.memory_space<vmem>>, vector<1x8x512xf32>
    %17 = vector.shape_cast %16 : vector<1x8x512xf32> to vector<8x512xf32>
    %18 = arith.addf %15, %17 : vector<8x512xf32>
    %19 = vector.extract_strided_slice %18 {offsets = [0, 0], sizes = [8, 128], strides = [1, 1]} : vector<8x512xf32> to vector<8x128xf32>
    %20 = math.tanh %19 : vector<8x128xf32>
    %21 = vector.extract_strided_slice %18 {offsets = [0, 128], sizes = [8, 128], strides = [1, 1]} : vector<8x512xf32> to vector<8x128xf32>
    %22 = math.tanh %21 : vector<8x128xf32>
    %23 = vector.extract_strided_slice %18 {offsets = [0, 256], sizes = [8, 128], strides = [1, 1]} : vector<8x512xf32> to vector<8x128xf32>
    %24 = vector.extract_strided_slice %18 {offsets = [0, 384], sizes = [8, 128], strides = [1, 1]} : vector<8x512xf32> to vector<8x128xf32>
    %25 = arith.mulf %23, %6 : vector<8x128xf32>
    %26 = arith.addf %25, %24 : vector<8x128xf32>
    %27 = arith.negf %26 : vector<8x128xf32>
    %28 = math.exp %27 : vector<8x128xf32>
    %cst_19 = arith.constant 1.000000e+00 : f32
    %29 = vector.broadcast %cst_19 : f32 to vector<8x128xf32>
    %30 = arith.addf %29, %28 : vector<8x128xf32>
    %31 = arith.divf %29, %30 : vector<8x128xf32>
    %cst_20 = arith.constant 1.000000e+00 : f32
    %32 = vector.broadcast %cst_20 : f32 to vector<8x128xf32>
    %33 = arith.subf %32, %31 : vector<8x128xf32>
    %34 = arith.mulf %20, %33 : vector<8x128xf32>
    %35 = arith.mulf %31, %22 : vector<8x128xf32>
    %36 = arith.addf %34, %35 : vector<8x128xf32>
    %c0_21 = arith.constant 0 : index
    %c0_22 = arith.constant 0 : index
    %c0_23 = arith.constant 0 : index
    %37 = vector.load %arg7[%c0_21, %c0_22, %c0_23] : memref<3x8x128xf32, #tpu.memory_space<vmem>>, vector<1x8x128xf32>
    %38 = vector.shape_cast %37 : vector<1x8x128xf32> to vector<8x128xf32>
    %39 = vector.shape_cast %36 : vector<8x128xf32> to vector<1x8x128xf32>
    tpu.vector_store %arg7[%c0_21, %c0_22, %c0_23], %39 {strides = array<i32>} : memref<3x8x128xf32, #tpu.memory_space<vmem>>, vector<1x8x128xf32>,
    %c1 = arith.constant 1 : index
    %c0_24 = arith.constant 0 : index
    %c0_25 = arith.constant 0 : index
    %40 = vector.load %arg7[%c1, %c0_24, %c0_25] : memref<3x8x128xf32, #tpu.memory_space<vmem>>, vector<1x8x128xf32>
    %41 = vector.shape_cast %40 : vector<1x8x128xf32> to vector<8x128xf32>
    %c1_26 = arith.constant 1 : index
    %c0_27 = arith.constant 0 : index
    %c0_28 = arith.constant 0 : index
    %42 = vector.load %arg3[%c1_26, %c0_27, %c0_28] : memref<3x128x512xf32, #tpu.memory_space<vmem>>, vector<1x128x512xf32>
    %43 = vector.shape_cast %42 : vector<1x128x512xf32> to vector<128x512xf32>
    %cst_29 = arith.constant dense<0.000000e+00> : vector<8x512xf32>
    %44 = tpu.matmul %36, %43, %cst_29 {dimension_numbers = #tpu.dot_dimension_numbers<[1], [0], [0], [1], [0, 0, 1, 1], [], []>} : vector<8x128xf32>, vector<128x512xf32>, vector<8x512xf32> -> vector<8x512xf32>
    %c1_30 = arith.constant 1 : index
    %c0_31 = arith.constant 0 : index
    %c0_32 = arith.constant 0 : index
    %45 = vector.load %arg4[%c1_30, %c0_31, %c0_32] : memref<3x128x512xf32, #tpu.memory_space<vmem>>, vector<1x128x512xf32>
    %46 = vector.shape_cast %45 : vector<1x128x512xf32> to vector<128x512xf32>
    %cst_33 = arith.constant dense<0.000000e+00> : vector<8x512xf32>
    %47 = tpu.matmul %41, %46, %cst_33 {dimension_numbers = #tpu.dot_dimension_numbers<[1], [0], [0], [1], [0, 0, 1, 1], [], []>} : vector<8x128xf32>, vector<128x512xf32>, vector<8x512xf32> -> vector<8x512xf32>
    %48 = arith.addf %44, %47 : vector<8x512xf32>
    %c1_34 = arith.constant 1 : index
    %c0_35 = arith.constant 0 : index
    %c0_36 = arith.constant 0 : index
    %49 = vector.load %arg5[%c1_34, %c0_35, %c0_36] : memref<3x8x512xf32, #tpu.memory_space<vmem>>, vector<1x8x512xf32>
    %50 = vector.shape_cast %49 : vector<1x8x512xf32> to vector<8x512xf32>
    %51 = arith.addf %48, %50 : vector<8x512xf32>
    %52 = vector.extract_strided_slice %51 {offsets = [0, 0], sizes = [8, 128], strides = [1, 1]} : vector<8x512xf32> to vector<8x128xf32>
    %53 = math.tanh %52 : vector<8x128xf32>
    %54 = vector.extract_strided_slice %51 {offsets = [0, 128], sizes = [8, 128], strides = [1, 1]} : vector<8x512xf32> to vector<8x128xf32>
    %55 = math.tanh %54 : vector<8x128xf32>
    %56 = vector.extract_strided_slice %51 {offsets = [0, 256], sizes = [8, 128], strides = [1, 1]} : vector<8x512xf32> to vector<8x128xf32>
    %57 = vector.extract_strided_slice %51 {offsets = [0, 384], sizes = [8, 128], strides = [1, 1]} : vector<8x512xf32> to vector<8x128xf32>
    %58 = arith.mulf %56, %6 : vector<8x128xf32>
    %59 = arith.addf %58, %57 : vector<8x128xf32>
    %60 = arith.negf %59 : vector<8x128xf32>
    %61 = math.exp %60 : vector<8x128xf32>
    %cst_37 = arith.constant 1.000000e+00 : f32
    %62 = vector.broadcast %cst_37 : f32 to vector<8x128xf32>
    %63 = arith.addf %62, %61 : vector<8x128xf32>
    %64 = arith.divf %62, %63 : vector<8x128xf32>
    %cst_38 = arith.constant 1.000000e+00 : f32
    %65 = vector.broadcast %cst_38 : f32 to vector<8x128xf32>
    %66 = arith.subf %65, %64 : vector<8x128xf32>
    %67 = arith.mulf %53, %66 : vector<8x128xf32>
    %68 = arith.mulf %64, %55 : vector<8x128xf32>
    %69 = arith.addf %67, %68 : vector<8x128xf32>
    %c1_39 = arith.constant 1 : index
    %c0_40 = arith.constant 0 : index
    %c0_41 = arith.constant 0 : index
    %70 = vector.load %arg7[%c1_39, %c0_40, %c0_41] : memref<3x8x128xf32, #tpu.memory_space<vmem>>, vector<1x8x128xf32>
    %71 = vector.shape_cast %70 : vector<1x8x128xf32> to vector<8x128xf32>
    %72 = vector.shape_cast %69 : vector<8x128xf32> to vector<1x8x128xf32>
    tpu.vector_store %arg7[%c1_39, %c0_40, %c0_41], %72 {strides = array<i32>} : memref<3x8x128xf32, #tpu.memory_space<vmem>>, vector<1x8x128xf32>,
    %c2 = arith.constant 2 : index
    %c0_42 = arith.constant 0 : index
    %c0_43 = arith.constant 0 : index
    %73 = vector.load %arg7[%c2, %c0_42, %c0_43] : memref<3x8x128xf32, #tpu.memory_space<vmem>>, vector<1x8x128xf32>
    %74 = vector.shape_cast %73 : vector<1x8x128xf32> to vector<8x128xf32>
    %c2_44 = arith.constant 2 : index
    %c0_45 = arith.constant 0 : index
    %c0_46 = arith.constant 0 : index
    %75 = vector.load %arg3[%c2_44, %c0_45, %c0_46] : memref<3x128x512xf32, #tpu.memory_space<vmem>>, vector<1x128x512xf32>
    %76 = vector.shape_cast %75 : vector<1x128x512xf32> to vector<128x512xf32>
    %cst_47 = arith.constant dense<0.000000e+00> : vector<8x512xf32>
    %77 = tpu.matmul %69, %76, %cst_47 {dimension_numbers = #tpu.dot_dimension_numbers<[1], [0], [0], [1], [0, 0, 1, 1], [], []>} : vector<8x128xf32>, vector<128x512xf32>, vector<8x512xf32> -> vector<8x512xf32>
    %c2_48 = arith.constant 2 : index
    %c0_49 = arith.constant 0 : index
    %c0_50 = arith.constant 0 : index
    %78 = vector.load %arg4[%c2_48, %c0_49, %c0_50] : memref<3x128x512xf32, #tpu.memory_space<vmem>>, vector<1x128x512xf32>
    %79 = vector.shape_cast %78 : vector<1x128x512xf32> to vector<128x512xf32>
    %cst_51 = arith.constant dense<0.000000e+00> : vector<8x512xf32>
    %80 = tpu.matmul %74, %79, %cst_51 {dimension_numbers = #tpu.dot_dimension_numbers<[1], [0], [0], [1], [0, 0, 1, 1], [], []>} : vector<8x128xf32>, vector<128x512xf32>, vector<8x512xf32> -> vector<8x512xf32>
    %81 = arith.addf %77, %80 : vector<8x512xf32>
    %c2_52 = arith.constant 2 : index
    %c0_53 = arith.constant 0 : index
    %c0_54 = arith.constant 0 : index
    %82 = vector.load %arg5[%c2_52, %c0_53, %c0_54] : memref<3x8x512xf32, #tpu.memory_space<vmem>>, vector<1x8x512xf32>
    %83 = vector.shape_cast %82 : vector<1x8x512xf32> to vector<8x512xf32>
    %84 = arith.addf %81, %83 : vector<8x512xf32>
    %85 = vector.extract_strided_slice %84 {offsets = [0, 0], sizes = [8, 128], strides = [1, 1]} : vector<8x512xf32> to vector<8x128xf32>
    %86 = math.tanh %85 : vector<8x128xf32>
    %87 = vector.extract_strided_slice %84 {offsets = [0, 128], sizes = [8, 128], strides = [1, 1]} : vector<8x512xf32> to vector<8x128xf32>
    %88 = math.tanh %87 : vector<8x128xf32>
    %89 = vector.extract_strided_slice %84 {offsets = [0, 256], sizes = [8, 128], strides = [1, 1]} : vector<8x512xf32> to vector<8x128xf32>
    %90 = vector.extract_strided_slice %84 {offsets = [0, 384], sizes = [8, 128], strides = [1, 1]} : vector<8x512xf32> to vector<8x128xf32>
    %91 = arith.mulf %89, %6 : vector<8x128xf32>
    %92 = arith.addf %91, %90 : vector<8x128xf32>
    %93 = arith.negf %92 : vector<8x128xf32>
    %94 = math.exp %93 : vector<8x128xf32>
    %cst_55 = arith.constant 1.000000e+00 : f32
    %95 = vector.broadcast %cst_55 : f32 to vector<8x128xf32>
    %96 = arith.addf %95, %94 : vector<8x128xf32>
    %97 = arith.divf %95, %96 : vector<8x128xf32>
    %cst_56 = arith.constant 1.000000e+00 : f32
    %98 = vector.broadcast %cst_56 : f32 to vector<8x128xf32>
    %99 = arith.subf %98, %97 : vector<8x128xf32>
    %100 = arith.mulf %86, %99 : vector<8x128xf32>
    %101 = arith.mulf %97, %88 : vector<8x128xf32>
    %102 = arith.addf %100, %101 : vector<8x128xf32>
    %c2_57 = arith.constant 2 : index
    %c0_58 = arith.constant 0 : index
    %c0_59 = arith.constant 0 : index
    %103 = vector.load %arg7[%c2_57, %c0_58, %c0_59] : memref<3x8x128xf32, #tpu.memory_space<vmem>>, vector<1x8x128xf32>
    %104 = vector.shape_cast %103 : vector<1x8x128xf32> to vector<8x128xf32>
    %105 = vector.shape_cast %102 : vector<8x128xf32> to vector<1x8x128xf32>
    tpu.vector_store %arg7[%c2_57, %c0_58, %c0_59], %105 {strides = array<i32>} : memref<3x8x128xf32, #tpu.memory_space<vmem>>, vector<1x8x128xf32>,
    %c0_60 = arith.constant 0 : index
    %c0_61 = arith.constant 0 : index
    %c0_62 = arith.constant 0 : index
    %106 = vector.load %arg6[%c0_60, %c0_61, %c0_62] : memref<1x8x128xf32, #tpu.memory_space<vmem>>, vector<1x8x128xf32>
    %107 = vector.shape_cast %106 : vector<1x8x128xf32> to vector<8x128xf32>
    %108 = vector.shape_cast %102 : vector<8x128xf32> to vector<1x8x128xf32>
    tpu.vector_store %arg6[%c0_60, %c0_61, %c0_62], %108 {strides = array<i32>} : memref<1x8x128xf32, #tpu.memory_space<vmem>>, vector<1x8x128xf32>,
    return
  }
  func.func @transform_0(%arg0: i32) -> (i32, i32, i32) {
    %c0_i32 = arith.constant 0 : i32
    %c0_i32_0 = arith.constant 0 : i32
    %c0_i32_1 = arith.constant 0 : i32
    return %arg0, %c0_i32, %c0_i32_0 : i32, i32, i32
  }
  func.func @transform_1(%arg0: i32) -> (i32, i32, i32) {
    %c0_i32 = arith.constant 0 : i32
    %c0_i32_0 = arith.constant 0 : i32
    %c0_i32_1 = arith.constant 0 : i32
    return %arg0, %c0_i32, %c0_i32_0 : i32, i32, i32
  }
  func.func @transform_2(%arg0: i32) -> (i32, i32, i32) {
    %c0_i32 = arith.constant 0 : i32
    %c0_i32_0 = arith.constant 0 : i32
    %c0_i32_1 = arith.constant 0 : i32
    %c0_i32_2 = arith.constant 0 : i32
    return %c0_i32, %c0_i32_0, %c0_i32_1 : i32, i32, i32
  }
  func.func @transform_3(%arg0: i32) -> (i32, i32, i32) {
    %c0_i32 = arith.constant 0 : i32
    %c0_i32_0 = arith.constant 0 : i32
    %c0_i32_1 = arith.constant 0 : i32
    %c0_i32_2 = arith.constant 0 : i32
    return %c0_i32, %c0_i32_0, %c0_i32_1 : i32, i32, i32
  }
  func.func @transform_4(%arg0: i32) -> (i32, i32, i32) {
    %c0_i32 = arith.constant 0 : i32
    %c0_i32_0 = arith.constant 0 : i32
    %c0_i32_1 = arith.constant 0 : i32
    %c0_i32_2 = arith.constant 0 : i32
    return %c0_i32, %c0_i32_0, %c0_i32_1 : i32, i32, i32
  }
  func.func @transform_5(%arg0: i32) -> (i32, i32, i32) {
    %c0_i32 = arith.constant 0 : i32
    %c0_i32_0 = arith.constant 0 : i32
    %c0_i32_1 = arith.constant 0 : i32
    return %arg0, %c0_i32, %c0_i32_0 : i32, i32, i32
  }
}

</mosaic_0001>

<bundles_post_ra>
// kernel: wired_cfc_forward_pallas.1
= control target key start
LH: loop header
LB: loop body
LE: loop exit
PB: predicated region body
PF: predicated region fallthrough
CT: control target
= control target key end

     0   :  { %10 = vsyncpa [#allocation4], 0  ;;  %s2439_s0 = inlined_call_operand.vmem [shape: f32[8,8,128], index: 0, kind: input, shape index: {}]   ;;  %s2440_s1 = inlined_call_operand.vmem [shape: f32[8,8,128], index: 1, kind: input, shape index: {}]   ;;  %s2441_s2 = inlined_call_operand.hbm [shape: f32[3,128,512], index: 2, kind: input, shape index: {}]   ;;  %s2442_s3 = inlined_call_operand.hbm [shape: f32[3,128,512], index: 3, kind: input, shape index: {}]   ;;  %s2443_s4 = inlined_call_operand.vmem [shape: f32[3,8,512], index: 4, kind: input, shape index: {}]   ;;  %s2444_s5 = inlined_call_operand.vmem [shape: f32[8,8,128], index: 5, kind: output, shape index: {}]  }
   0x1   :  { %11 = vsyncpa [#allocation6], 0  ;;  %s2267_s18 = smov 0  }
   0x2 LB: > { %s2273_s19 = sadd.s32 4294967295, %s2229_s18   ;;  %p1682_p0 = scmp.ge.s32.totalorder %s2229_s18, 1  ;;  %s2229_s18 = sphi %s2267_s18, %s17_s18  }
   0x3   : > { %p163_p1 = scmp.lt.s32.totalorder %s2229_s18, 9  ;;  %s2231_s20 = smov [#allocation3]  }
   0x4   : > { %s175_s21 = sshll.u32 %s2231_s20, 4  ;;  %p2445_p4 = scmp.eq.s32.totalorder %s2273_s19, 0  ;;  %s176_s21 = int_to_ptr.vmem [resolvable:$true] %s175_s21 }
   0x5   : > { %p2278_p3 = pnand %p1682_p0, %p163_p1  ;;  %s2232_s23 = smov [#allocation5]  }
   0x6   : > { %s188_s24 = sshll.u32 %s2232_s23, 4  ;;  %s2159_s28 = scalar_lea.hbm %s2441_s2, 24576  ;;  %s2291_s24 = int_to_ptr.vmem [resolvable:$true] %s188_s24 }
   0x7   : > { %s2447_s22 = scalar_select %p2278_p3, 1, 0 }
   0x8   : > { %p2110_p5 = pneg %p2278_p3  ;;  %p2160_p7 = scmp.ne.s32.totalorder %s2441_s2, %s2159_s28 }
   0x9   : > { %p2166_p11 = scmp.lt.u32.totalorder %s2159_s28, %s2441_s2 }
   0xa   : > { %p2287_p6 = pnand %p2445_p4, %p2110_p5 }
   0xc   : > { %p2161_p8 = pneg %p2287_p6 }
   0xe   : > { %p2162_p9 = pnand %p2161_p8, %p2160_p7 }
  0x10   : > { %p2163_p10 = pneg %p2162_p9 }
  0x12   : > { %p2168_p12 = pnand %p2166_p11, %p2163_p10 }
  0x14   : > { %2171 = shalt.err (!%p2168_p12)
}
  0x15   : > { %s2172_s8 = scalar_lea.vmem %s176_s21, 24576  ;;  %p2180_p5 = scmp.lt.s32.totalorder %s176_s21, %s176_s21 }
  0x16   : > { %p2173_p13 = scmp.ne.s32.totalorder %s176_s21, %s2172_s8  ;;  %p2181_p2 = scmp.lt.s32.totalorder %s2172_s8, %s2172_s8 }
  0x18   : > { %p2175_p0 = pnand %p2173_p13, %p2161_p8  ;;  %p2182_p4 = por %p2181_p2, %p2180_p5 }
  0x1a   : > { %p2176_p1 = pneg %p2175_p0 }
  0x1c   : > { %p2183_p3 = pnand %p2182_p4, %p2176_p1 }
  0x1e   : > { %2186 = shalt.err (!%p2183_p3)
}
  0x1f   : > { %s2233_s9 = smov 512   ;;  %s2234_s10 = smov 32  }
  0x20   : > { %2113 = dma.hbm_to_vmem [thread:$0]  (!%p2287_p6), %s2441_s2, 24576, %s176_s21, [#allocation4], %s2233_s9, %s2233_s9, %s2234_s10  }
  0x21   : > { %s2187_s15 = scalar_lea.hbm %s2442_s3, 24576 }
  0x22   : > { %p2188_p7 = scmp.ne.s32.totalorder %s2442_s3, %s2187_s15  ;;  %p2194_p4 = scmp.lt.u32.totalorder %s2187_s15, %s2442_s3 }
  0x24   : > { %p2190_p2 = pnand %p2188_p7, %p2161_p8 }
  0x26   : > { %p2191_p3 = pneg %p2190_p2 }
  0x28   : > { %p2196_p9 = pnand %p2194_p4, %p2191_p3 }
  0x2a   : > { %2199 = shalt.err (!%p2196_p9)
}
  0x2b   : > { %s2200_s21 = scalar_lea.vmem %s2291_s24, 24576  ;;  %p2208_p13 = scmp.lt.s32.totalorder %s2291_s24, %s2291_s24 }
  0x2c   : > { %p2201_p10 = scmp.ne.s32.totalorder %s2291_s24, %s2200_s21  ;;  %p2209_p0 = scmp.lt.s32.totalorder %s2200_s21, %s2200_s21 }
  0x2e   : > { %p2203_p11 = pnand %p2201_p10, %p2161_p8  ;;  %p2210_p1 = por %p2209_p0, %p2208_p13 }
  0x30   : > { %p2204_p12 = pneg %p2203_p11 }
  0x32   : > { %p2211_p5 = pnand %p2210_p1, %p2204_p12 }
  0x34   : > { %2214 = shalt.err (!%p2211_p5)
}
  0x35   : > { %2116 = dma.hbm_to_vmem [thread:$0]  (!%p2287_p6), %s2442_s3, 24576, %s2291_s24, [#allocation6], %s2233_s9, %s2233_s9, %s2234_s10  }
  0x36   : > { %p2449_p7 = scmp.ne.s32.totalorder %s2447_s22, 0 }
  0x37   : > { %p2450_p2 = scmp.eq.s32.totalorder (!%p2449_p7), %s2273_s19, 0 }
  0x38   : > { %221 = sbr.rel (%p2449_p7) target bundleno = 897 (0x381), region = 40 }
  0x3f   : > { %2220 = dma.done.wait (%p2450_p2), [#allocation4], 24576   ;;  %p2451_p8 = pmov %p2450_p2 }
  0x40   : > { %p2452_p3 = pmov %p2450_p2 }
  0x41   : > { %2222 = vsyncadd (%p2451_p8), [#allocation4], 4294942720 }
  0x42   : > { %2224 = dma.done.wait (%p2452_p3), [#allocation6], 24576   ;;  %p2453_p4 = pmov %p2450_p2 }
  0x43   : > { %p255_p9 = scmp.lt.s32.totalorder %s2273_s19, 7  ;;  %p2454_p6 = scmp.ne.s32.totalorder %s2273_s19, 0 }
  0x44   : > { %2226 = vsyncadd (%p2453_p4), [#allocation6], 4294942720  ;;  %v2235_v0 = vmov (!%p2454_p6), 0.0  }
  0x45   : > { %s256_s25 = scalar_select %p255_p9, %s2273_s19, 7 }
  0x46   : > { %270 = sbr.rel (%p2454_p6) target bundleno = 77 (0x4d), region = 52  ;;  %271 = vst [vmem:[#allocation2] sm:$0xff] (!%p2454_p6), %v2235_v0  ;;  %272 = vst [vmem:[#allocation2 + $0x8] sm:$0xff] (!%p2454_p6), %v2235_v0 }
  0x47   : > { %s2352_s24 = sshll.u32 %s256_s25, 3  ;;  %273 = vst [vmem:[#allocation2 + $0x10] sm:$0xff] (!%p2454_p6), %v2235_v0 }
  0x48   : > { %s258_s29 = scalar_lea.vmem %s2439_s0, %s2352_s24  ;;  %s262_s7 = scalar_lea.vmem %s2440_s1, %s2352_s24 }
  0x49   : > { %s266_s10 = scalar_lea.vmem %s2444_s5, %s2352_s24 }
  0x4d PF: > { %v342_v1 = vld [vmem:[#allocation5 + $0x8] sm:$0xff]  ;;  %v344_v3 = vld [vmem:[#allocation5 + $0x18] sm:$0xff]  ;;  %v341_v6 = vld [vmem:[#allocation5] sm:$0xff]  ;;  %v2236_v8 = vmov 0.0  }
  0x4e   : > { %v346_v2 = vld [vmem:[#allocation5 + $0x28] sm:$0xff]  ;;  %v348_v5 = vld [vmem:[#allocation5 + $0x38] sm:$0xff]  ;;  %v345_v7 = vld [vmem:[#allocation5 + $0x20] sm:$0xff]  ;;  %469 = vmatprep.mubr.f32.mxu0 %v2236_v8  ;;  %540 = vmatprep.mubr.f32.mxu1 %v2236_v8 }
  0x4f   : > { %v1706_v4 = vpack.c.bf16 %v346_v2, %v342_v1  ;;  %v1738_v9 = vpack.c.bf16 %v348_v5, %v344_v3  ;;  %v1708_v10 = vpack.c.bf16 %v345_v7, %v341_v6  ;;  %v343_v11 = vld [vmem:[#allocation5 + $0x10] sm:$0xff]  ;;  %v350_v13 = vld [vmem:[#allocation5 + $0x48] sm:$0xff]  ;;  %v352_v16 = vld [vmem:[#allocation5 + $0x58] sm:$0xff] }
  0x50   : > { %v347_v12 = vld [vmem:[#allocation5 + $0x30] sm:$0xff]  ;;  %v354_v15 = vld [vmem:[#allocation5 + $0x68] sm:$0xff]  ;;  %v356_v17 = vld [vmem:[#allocation5 + $0x78] sm:$0xff] }
  0x51   : > { %1707 = vmatprep.subr.bf16.mxu0 %v1706_v4  ;;  %v1740_v14 = vpack.c.bf16 %v347_v12, %v343_v11  ;;  %1739 = vmatprep.subr.bf16.mxu1 %v1738_v9  ;;  %v1710_v18 = vpack.c.bf16 %v354_v15, %v350_v13  ;;  %v1742_v19 = vpack.c.bf16 %v356_v17, %v352_v16  ;;  %v349_v20 = vld [vmem:[#allocation5 + $0x40] sm:$0xff]  ;;  %v351_v22 = vld [vmem:[#allocation5 + $0x50] sm:$0xff]  ;;  %v358_v25 = vld [vmem:[#allocation5 + $0x88] sm:$0xff] }
  0x52   : > { %1709 = vmatpush1.bf16.msra.mxu0 %v1708_v10  ;;  %v353_v21 = vld [vmem:[#allocation5 + $0x60] sm:$0xff]  ;;  %v355_v24 = vld [vmem:[#allocation5 + $0x70] sm:$0xff]  ;;  %v362_v26 = vld [vmem:[#allocation5 + $0xa8] sm:$0xff] }
  0x53   : > { %1741 = vmatpush1.bf16.msra.mxu1 %v1740_v14  ;;  %v1712_v23 = vpack.c.bf16 %v353_v21, %v349_v20  ;;  %1711 = vmatprep.subr.bf16.mxu0 %v1710_v18  ;;  %v1744_v27 = vpack.c.bf16 %v355_v24, %v351_v22  ;;  %v1714_v28 = vpack.c.bf16 %v362_v26, %v358_v25  ;;  %v360_v29 = vld [vmem:[#allocation5 + $0x98] sm:$0xff]  ;;  %v357_v31 = vld [vmem:[#allocation5 + $0x80] sm:$0xff]  ;;  %v359_v34 = vld [vmem:[#allocation5 + $0x90] sm:$0xff] }
  0x54   : > { %1743 = vmatprep.subr.bf16.mxu1 %v1742_v19  ;;  %v364_v30 = vld [vmem:[#allocation5 + $0xb8] sm:$0xff]  ;;  %v361_v33 = vld [vmem:[#allocation5 + $0xa0] sm:$0xff]  ;;  %v363_v35 = vld [vmem:[#allocation5 + $0xb0] sm:$0xff] }
  0x55   : > { %v1746_v32 = vpack.c.bf16 %v364_v30, %v360_v29  ;;  %v1716_v36 = vpack.c.bf16 %v361_v33, %v357_v31  ;;  %v366_v37 = vld [vmem:[#allocation5 + $0xc8] sm:$0xff]  ;;  %v368_v39 = vld [vmem:[#allocation5 + $0xd8] sm:$0xff]  ;;  %v1748_v40 = vpack.c.bf16 %v363_v35, %v359_v34  ;;  %v365_v43 = vld [vmem:[#allocation5 + $0xc0] sm:$0xff] }
  0x56   : > { %1713 = vmatpush1.bf16.msra.mxu0 %v1712_v23  ;;  %v370_v38 = vld [vmem:[#allocation5 + $0xe8] sm:$0xff]  ;;  %v372_v42 = vld [vmem:[#allocation5 + $0xf8] sm:$0xff]  ;;  %v369_v44 = vld [vmem:[#allocation5 + $0xe0] sm:$0xff] }
  0x57   : > { %1745 = vmatpush1.bf16.msra.mxu1 %v1744_v27  ;;  %1715 = vmatprep.subr.bf16.mxu0 %v1714_v28  ;;  %v1718_v41 = vpack.c.bf16 %v370_v38, %v366_v37  ;;  %v1750_v45 = vpack.c.bf16 %v372_v42, %v368_v39  ;;  %v367_v46 = vld [vmem:[#allocation5 + $0xd0] sm:$0xff]  ;;  %v374_v48 = vld [vmem:[#allocation5 + $0x108] sm:$0xff]  ;;  %v376_v50 = vld [vmem:[#allocation5 + $0x118] sm:$0xff]  ;;  %v1720_v52 = vpack.c.bf16 %v369_v44, %v365_v43 }
  0x58   : > { %1747 = vmatprep.subr.bf16.mxu1 %v1746_v32  ;;  %v371_v47 = vld [vmem:[#allocation5 + $0xf0] sm:$0xff]  ;;  %v378_v49 = vld [vmem:[#allocation5 + $0x128] sm:$0xff]  ;;  %v380_v51 = vld [vmem:[#allocation5 + $0x138] sm:$0xff] }
  0x59   : > { %v1752_v53 = vpack.c.bf16 %v371_v47, %v367_v46  ;;  %v1722_v54 = vpack.c.bf16 %v378_v49, %v374_v48  ;;  %v373_v55 = vld [vmem:[#allocation5 + $0x100] sm:$0xff]  ;;  %v375_v57 = vld [vmem:[#allocation5 + $0x110] sm:$0xff]  ;;  %v1754_v58 = vpack.c.bf16 %v380_v51, %v376_v50  ;;  %v382_v60 = vld [vmem:[#allocation5 + $0x148] sm:$0xff] }
  0x5a   : > { %1717 = vmatpush1.bf16.msra.mxu0 %v1716_v36  ;;  %v377_v56 = vld [vmem:[#allocation5 + $0x120] sm:$0xff]  ;;  %v379_v59 = vld [vmem:[#allocation5 + $0x130] sm:$0xff]  ;;  %v386_v61 = vld [vmem:[#allocation5 + $0x168] sm:$0xff] }
  0x5b   : > { %1749 = vmatpush1.bf16.msra.mxu1 %v1748_v40  ;;  %1719 = vmatprep.subr.bf16.mxu0 %v1718_v41  ;;  %v384_v62 = vld [vmem:[#allocation5 + $0x158] sm:$0xff]  ;;  %v1724_v0 = vpack.c.bf16 %v377_v56, %v373_v55  ;;  %v1756_v1 = vpack.c.bf16 %v379_v59, %v375_v57  ;;  %v1726_v2 = vpack.c.bf16 %v386_v61, %v382_v60  ;;  %v381_v3 = vld [vmem:[#allocation5 + $0x140] sm:$0xff]  ;;  %v383_v5 = vld [vmem:[#allocation5 + $0x150] sm:$0xff] }
  0x5c   : > { %1751 = vmatprep.subr.bf16.mxu1 %v1750_v45  ;;  %v388_v63 = vld [vmem:[#allocation5 + $0x178] sm:$0xff]  ;;  %v385_v4 = vld [vmem:[#allocation5 + $0x160] sm:$0xff]  ;;  %v387_v7 = vld [vmem:[#allocation5 + $0x170] sm:$0xff] }
  0x5d   : > { %v1758_v6 = vpack.c.bf16 %v388_v63, %v384_v62  ;;  %v390_v9 = vld [vmem:[#allocation5 + $0x188] sm:$0xff]  ;;  %v392_v11 = vld [vmem:[#allocation5 + $0x198] sm:$0xff]  ;;  %v1728_v13 = vpack.c.bf16 %v385_v4, %v381_v3  ;;  %v1760_v14 = vpack.c.bf16 %v387_v7, %v383_v5  ;;  %v389_v16 = vld [vmem:[#allocation5 + $0x180] sm:$0xff] }
  0x5e   : > { %1721 = vmatpush1.bf16.msra.mxu0 %v1720_v52  ;;  %v394_v10 = vld [vmem:[#allocation5 + $0x1a8] sm:$0xff]  ;;  %v396_v12 = vld [vmem:[#allocation5 + $0x1b8] sm:$0xff]  ;;  %v393_v17 = vld [vmem:[#allocation5 + $0x1a0] sm:$0xff] }
  0x5f   : > { %1753 = vmatpush1.bf16.msra.mxu1 %v1752_v53  ;;  %1723 = vmatprep.subr.bf16.mxu0 %v1722_v54  ;;  %v1730_v15 = vpack.c.bf16 %v394_v10, %v390_v9  ;;  %v391_v18 = vld [vmem:[#allocation5 + $0x190] sm:$0xff]  ;;  %v1762_v19 = vpack.c.bf16 %v396_v12, %v392_v11  ;;  %v398_v21 = vld [vmem:[#allocation5 + $0x1c8] sm:$0xff]  ;;  %v400_v23 = vld [vmem:[#allocation5 + $0x1d8] sm:$0xff]  ;;  %v1732_v25 = vpack.c.bf16 %v393_v17, %v389_v16 }
  0x60   : > { %1755 = vmatprep.subr.bf16.mxu1 %v1754_v58  ;;  %v395_v20 = vld [vmem:[#allocation5 + $0x1b0] sm:$0xff]  ;;  %v402_v22 = vld [vmem:[#allocation5 + $0x1e8] sm:$0xff]  ;;  %v404_v24 = vld [vmem:[#allocation5 + $0x1f8] sm:$0xff] }
  0x61   : > { %v1764_v26 = vpack.c.bf16 %v395_v20, %v391_v18  ;;  %v1734_v27 = vpack.c.bf16 %v402_v22, %v398_v21  ;;  %v397_v28 = vld [vmem:[#allocation5 + $0x1c0] sm:$0xff]  ;;  %v399_v30 = vld [vmem:[#allocation5 + $0x1d0] sm:$0xff]  ;;  %v1766_v31 = vpack.c.bf16 %v404_v24, %v400_v23  ;;  %v278_v33 = vld [vmem:[#allocation3 + $0x8] sm:$0xff] }
  0x62   : > { %1725 = vmatpush1.bf16.msra.mxu0 %v1724_v0  ;;  %v401_v29 = vld [vmem:[#allocation5 + $0x1e0] sm:$0xff]  ;;  %v403_v32 = vld [vmem:[#allocation5 + $0x1f0] sm:$0xff]  ;;  %v282_v34 = vld [vmem:[#allocation3 + $0x28] sm:$0xff] }
  0x63   : > { %1757 = vmatpush1.bf16.msra.mxu1 %v1756_v1  ;;  %1727 = vmatprep.subr.bf16.mxu0 %v1726_v2  ;;  %v280_v35 = vld [vmem:[#allocation3 + $0x18] sm:$0xff]  ;;  %v1736_v37 = vpack.c.bf16 %v401_v29, %v397_v28  ;;  %v1768_v38 = vpack.c.bf16 %v403_v32, %v399_v30  ;;  %v1770_v39 = vpack.c.bf16 %v282_v34, %v278_v33  ;;  %v277_v40 = vld [vmem:[#allocation3] sm:$0xff]  ;;  %v279_v42 = vld [vmem:[#allocation3 + $0x10] sm:$0xff] }
  0x64   : > { %1759 = vmatprep.subr.bf16.mxu1 %v1758_v6  ;;  %v284_v36 = vld [vmem:[#allocation3 + $0x38] sm:$0xff]  ;;  %v281_v41 = vld [vmem:[#allocation3 + $0x20] sm:$0xff]  ;;  %v283_v44 = vld [vmem:[#allocation3 + $0x30] sm:$0xff] }
  0x65   : > { %v1802_v43 = vpack.c.bf16 %v284_v36, %v280_v35  ;;  %v286_v45 = vld [vmem:[#allocation3 + $0x48] sm:$0xff]  ;;  %v288_v47 = vld [vmem:[#allocation3 + $0x58] sm:$0xff]  ;;  %v1772_v50 = vpack.c.bf16 %v281_v41, %v277_v40  ;;  %v1804_v51 = vpack.c.bf16 %v283_v44, %v279_v42  ;;  %v285_v53 = vld [vmem:[#allocation3 + $0x40] sm:$0xff] }
  0x66   : > { %1729 = vmatpush1.bf16.msra.mxu0 %v1728_v13  ;;  %v290_v46 = vld [vmem:[#allocation3 + $0x68] sm:$0xff]  ;;  %v292_v48 = vld [vmem:[#allocation3 + $0x78] sm:$0xff]  ;;  %v289_v54 = vld [vmem:[#allocation3 + $0x60] sm:$0xff] }
  0x67   : > { %1761 = vmatpush1.bf16.msra.mxu1 %v1760_v14  ;;  %1731 = vmatprep.subr.bf16.mxu0 %v1730_v15  ;;  %v276_v49 = vld [vmem:[#allocation2] sm:$0xff]  ;;  %v1774_v52 = vpack.c.bf16 %v290_v46, %v286_v45  ;;  %v287_v55 = vld [vmem:[#allocation3 + $0x50] sm:$0xff]  ;;  %v1806_v56 = vpack.c.bf16 %v292_v48, %v288_v47  ;;  %v296_v60 = vld [vmem:[#allocation3 + $0x98] sm:$0xff]  ;;  %v1776_v62 = vpack.c.bf16 %v289_v54, %v285_v53 }
  0x68   : > { %1763 = vmatprep.subr.bf16.mxu1 %v1762_v19  ;;  %v291_v57 = vld [vmem:[#allocation3 + $0x70] sm:$0xff]  ;;  %v294_v58 = vld [vmem:[#allocation3 + $0x88] sm:$0xff]  ;;  %v300_v61 = vld [vmem:[#allocation3 + $0xb8] sm:$0xff] }
  0x69   : > { %v298_v59 = vld [vmem:[#allocation3 + $0xa8] sm:$0xff]  ;;  %v1808_v63 = vpack.c.bf16 %v291_v57, %v287_v55  ;;  %v293_v1 = vld [vmem:[#allocation3 + $0x80] sm:$0xff]  ;;  %v295_v3 = vld [vmem:[#allocation3 + $0x90] sm:$0xff]  ;;  %v1810_v4 = vpack.c.bf16 %v300_v61, %v296_v60 }
  0x6a   : > { %1733 = vmatpush1.bf16.msra.mxu0 %v1732_v25  ;;  %v1778_v0 = vpack.c.bf16 %v298_v59, %v294_v58  ;;  %v297_v2 = vld [vmem:[#allocation3 + $0xa0] sm:$0xff]  ;;  %v299_v5 = vld [vmem:[#allocation3 + $0xb0] sm:$0xff]  ;;  %v302_v6 = vld [vmem:[#allocation3 + $0xc8] sm:$0xff] }
  0x6b   : > { %1765 = vmatpush1.bf16.msra.mxu1 %v1764_v26  ;;  %1735 = vmatprep.subr.bf16.mxu0 %v1734_v27  ;;  %v306_v7 = vld [vmem:[#allocation3 + $0xe8] sm:$0xff]  ;;  %v304_v9 = vld [vmem:[#allocation3 + $0xd8] sm:$0xff]  ;;  %v1780_v11 = vpack.c.bf16 %v297_v2, %v293_v1  ;;  %v1812_v12 = vpack.c.bf16 %v299_v5, %v295_v3  ;;  %v301_v14 = vld [vmem:[#allocation3 + $0xc0] sm:$0xff] }
  0x6c   : > { %1767 = vmatprep.subr.bf16.mxu1 %v1766_v31  ;;  %v308_v10 = vld [vmem:[#allocation3 + $0xf8] sm:$0xff]  ;;  %v1782_v13 = vpack.c.bf16 %v306_v7, %v302_v6  ;;  %v305_v15 = vld [vmem:[#allocation3 + $0xe0] sm:$0xff]  ;;  %v303_v16 = vld [vmem:[#allocation3 + $0xd0] sm:$0xff] }
  0x6d   : > { %v1814_v17 = vpack.c.bf16 %v308_v10, %v304_v9  ;;  %v307_v18 = vld [vmem:[#allocation3 + $0xf0] sm:$0xff]  ;;  %v310_v19 = vld [vmem:[#allocation3 + $0x108] sm:$0xff]  ;;  %v312_v21 = vld [vmem:[#allocation3 + $0x118] sm:$0xff]  ;;  %v1784_v23 = vpack.c.bf16 %v305_v15, %v301_v14 }
  0x6e   : > { %1737 = vmatpush1.bf16.msra.mxu0 %v1736_v37  ;;  %v314_v20 = vld [vmem:[#allocation3 + $0x128] sm:$0xff]  ;;  %v316_v22 = vld [vmem:[#allocation3 + $0x138] sm:$0xff]  ;;  %v1816_v24 = vpack.c.bf16 %v307_v18, %v303_v16  ;;  %v309_v26 = vld [vmem:[#allocation3 + $0x100] sm:$0xff] }
  0x6f   : > { %1769 = vmatpush1.bf16.msra.mxu1 %v1768_v38  ;;  %1771 = vmatprep.subr.bf16.mxu0 %v1770_v39  ;;  %v1786_v25 = vpack.c.bf16 %v314_v20, %v310_v19  ;;  %v313_v27 = vld [vmem:[#allocation3 + $0x120] sm:$0xff]  ;;  %v311_v28 = vld [vmem:[#allocation3 + $0x110] sm:$0xff]  ;;  %v1818_v29 = vpack.c.bf16 %v316_v22, %v312_v21  ;;  %v318_v31 = vld [vmem:[#allocation3 + $0x148] sm:$0xff] }
  0x70   : > { %1803 = vmatprep.subr.bf16.mxu1 %v1802_v43  ;;  %v315_v30 = vld [vmem:[#allocation3 + $0x130] sm:$0xff]  ;;  %v322_v32 = vld [vmem:[#allocation3 + $0x168] sm:$0xff]  ;;  %v320_v33 = vld [vmem:[#allocation3 + $0x158] sm:$0xff]  ;;  %v1788_v35 = vpack.c.bf16 %v313_v27, %v309_v26 }
  0x71   : > { %470 = vmatmul.mubr.f32.vlgmr.msra.gmra.mrb[0].mxu0 %v276_v49  ;;  %v324_v34 = vld [vmem:[#allocation3 + $0x178] sm:$0xff]  ;;  %v1820_v36 = vpack.c.bf16 %v315_v30, %v311_v28  ;;  %v1790_v37 = vpack.c.bf16 %v322_v32, %v318_v31  ;;  %v317_v38 = vld [vmem:[#allocation3 + $0x140] sm:$0xff]  ;;  %v319_v40 = vld [vmem:[#allocation3 + $0x150] sm:$0xff] }
  0x72   : > { %541 = vmatmul.mubr.f32.vlgmr.msra.gmra.mrb[0].mxu1 %v276_v49  ;;  %1773 = vmatpush1.bf16.msra.mxu0 %v1772_v50  ;;  %v321_v39 = vld [vmem:[#allocation3 + $0x160] sm:$0xff]  ;;  %v1822_v41 = vpack.c.bf16 %v324_v34, %v320_v33  ;;  %v323_v42 = vld [vmem:[#allocation3 + $0x170] sm:$0xff]  ;;  %v326_v43 = vld [vmem:[#allocation3 + $0x188] sm:$0xff] }
  0x73   : > { %1805 = vmatpush1.bf16.msra.mxu1 %v1804_v51  ;;  %1775 = vmatprep.subr.bf16.mxu0 %v1774_v52  ;;  %v330_v44 = vld [vmem:[#allocation3 + $0x1a8] sm:$0xff]  ;;  %v328_v45 = vld [vmem:[#allocation3 + $0x198] sm:$0xff]  ;;  %v1792_v47 = vpack.c.bf16 %v321_v39, %v317_v38  ;;  %v1824_v48 = vpack.c.bf16 %v323_v42, %v319_v40  ;;  %v325_v50 = vld [vmem:[#allocation3 + $0x180] sm:$0xff] }
  0x74   : > { %1807 = vmatprep.subr.bf16.mxu1 %v1806_v56  ;;  %611 = vmatprep.mubr.f32.mxu0 %v2236_v8  ;;  %v332_v46 = vld [vmem:[#allocation3 + $0x1b8] sm:$0xff]  ;;  %v1794_v49 = vpack.c.bf16 %v330_v44, %v326_v43  ;;  %v329_v51 = vld [vmem:[#allocation3 + $0x1a0] sm:$0xff]  ;;  %v327_v52 = vld [vmem:[#allocation3 + $0x190] sm:$0xff] }
  0x75   : > { %682 = vmatprep.mubr.f32.mxu1 %v2236_v8  ;;  %v1826_v53 = vpack.c.bf16 %v332_v46, %v328_v45  ;;  %v331_v54 = vld [vmem:[#allocation3 + $0x1b0] sm:$0xff]  ;;  %v334_v55 = vld [vmem:[#allocation3 + $0x1c8] sm:$0xff]  ;;  %v336_v57 = vld [vmem:[#allocation3 + $0x1d8] sm:$0xff]  ;;  %v1796_v59 = vpack.c.bf16 %v329_v51, %v325_v50 }
  0x76   : > { %1777 = vmatpush1.bf16.msra.mxu0 %v1776_v62  ;;  %v338_v56 = vld [vmem:[#allocation3 + $0x1e8] sm:$0xff]  ;;  %v340_v58 = vld [vmem:[#allocation3 + $0x1f8] sm:$0xff]  ;;  %v1828_v60 = vpack.c.bf16 %v331_v54, %v327_v52  ;;  %v333_v62 = vld [vmem:[#allocation3 + $0x1c0] sm:$0xff] }
  0x77   : > { %1809 = vmatpush1.bf16.msra.mxu1 %v1808_v63  ;;  %1779 = vmatprep.subr.bf16.mxu0 %v1778_v0  ;;  %v1798_v61 = vpack.c.bf16 %v338_v56, %v334_v55  ;;  %v337_v63 = vld [vmem:[#allocation3 + $0x1e0] sm:$0xff]  ;;  %v335_v0 = vld [vmem:[#allocation3 + $0x1d0] sm:$0xff]  ;;  %v1830_v1 = vpack.c.bf16 %v340_v58, %v336_v57  ;;  %v781_v3 = vld [vmem:[#allocation5 + $0x208] sm:$0xff] }
  0x78   : > { %1811 = vmatprep.subr.bf16.mxu1 %v1810_v4  ;;  %v339_v2 = vld [vmem:[#allocation3 + $0x1f0] sm:$0xff]  ;;  %v785_v4 = vld [vmem:[#allocation5 + $0x228] sm:$0xff]  ;;  %v783_v5 = vld [vmem:[#allocation5 + $0x218] sm:$0xff]  ;;  %v1800_v7 = vpack.c.bf16 %v337_v63, %v333_v62 }
  0x79   : > { %v787_v6 = vld [vmem:[#allocation5 + $0x238] sm:$0xff]  ;;  %v1832_v9 = vpack.c.bf16 %v339_v2, %v335_v0  ;;  %v1834_v10 = vpack.c.bf16 %v785_v4, %v781_v3  ;;  %v786_v15 = vld [vmem:[#allocation5 + $0x230] sm:$0xff]  ;;  %v789_v16 = vld [vmem:[#allocation5 + $0x248] sm:$0xff] }
  0x7a   : > { %1781 = vmatpush1.bf16.msra.mxu0 %v1780_v11  ;;  %v780_v11 = vld [vmem:[#allocation5 + $0x200] sm:$0xff]  ;;  %v1866_v14 = vpack.c.bf16 %v787_v6, %v783_v5  ;;  %v791_v18 = vld [vmem:[#allocation5 + $0x258] sm:$0xff]  ;;  %v274_v20 = vld [vmem:[%s258_s29] sm:$0xff] }
  0x7b   : > { %1813 = vmatpush1.bf16.msra.mxu1 %v1812_v12  ;;  %1783 = vmatprep.subr.bf16.mxu0 %v1782_v13  ;;  %v784_v12 = vld [vmem:[#allocation5 + $0x220] sm:$0xff]  ;;  %v782_v13 = vld [vmem:[#allocation5 + $0x210] sm:$0xff]  ;;  %v795_v19 = vld [vmem:[#allocation5 + $0x278] sm:$0xff] }
  0x7c   : > { %1815 = vmatprep.subr.bf16.mxu1 %v1814_v17  ;;  %v793_v17 = vld [vmem:[#allocation5 + $0x268] sm:$0xff]  ;;  %v1836_v21 = vpack.c.bf16 %v784_v12, %v780_v11  ;;  %v1868_v22 = vpack.c.bf16 %v786_v15, %v782_v13  ;;  %v790_v26 = vld [vmem:[#allocation5 + $0x250] sm:$0xff]  ;;  %v1870_v27 = vpack.c.bf16 %v795_v19, %v791_v18  ;;  %v799_v31 = vld [vmem:[#allocation5 + $0x298] sm:$0xff] }
  0x7d   : > { %v794_v28 = vld [vmem:[#allocation5 + $0x270] sm:$0xff]  ;;  %v801_v30 = vld [vmem:[#allocation5 + $0x2a8] sm:$0xff]  ;;  %v803_v32 = vld [vmem:[#allocation5 + $0x2b8] sm:$0xff] }
  0x7e   : > { %1785 = vmatpush1.bf16.msra.mxu0 %v1784_v23  ;;  %v1838_v23 = vpack.c.bf16 %v793_v17, %v789_v16  ;;  %v1872_v34 = vpack.c.bf16 %v794_v28, %v790_v26  ;;  %v798_v38 = vld [vmem:[#allocation5 + $0x290] sm:$0xff]  ;;  %v1874_v39 = vpack.c.bf16 %v803_v32, %v799_v31  ;;  %v809_v42 = vld [vmem:[#allocation5 + $0x2e8] sm:$0xff]  ;;  %v807_v43 = vld [vmem:[#allocation5 + $0x2d8] sm:$0xff] }
  0x7f   : > { %1817 = vmatpush1.bf16.msra.mxu1 %v1816_v24  ;;  %1787 = vmatprep.subr.bf16.mxu0 %v1786_v25  ;;  %v788_v24 = vld [vmem:[#allocation5 + $0x240] sm:$0xff]  ;;  %v802_v40 = vld [vmem:[#allocation5 + $0x2b0] sm:$0xff]  ;;  %v811_v44 = vld [vmem:[#allocation5 + $0x2f8] sm:$0xff] }
  0x80   : > { %1819 = vmatprep.subr.bf16.mxu1 %v1818_v29  ;;  %v792_v25 = vld [vmem:[#allocation5 + $0x260] sm:$0xff]  ;;  %v797_v29 = vld [vmem:[#allocation5 + $0x288] sm:$0xff]  ;;  %v1876_v46 = vpack.c.bf16 %v802_v40, %v798_v38  ;;  %v806_v50 = vld [vmem:[#allocation5 + $0x2d0] sm:$0xff]  ;;  %v1878_v51 = vpack.c.bf16 %v811_v44, %v807_v43 }
  0x81   : > { %v1840_v33 = vpack.c.bf16 %v792_v25, %v788_v24  ;;  %v810_v52 = vld [vmem:[#allocation5 + $0x2f0] sm:$0xff]  ;;  %v817_v54 = vld [vmem:[#allocation5 + $0x328] sm:$0xff]  ;;  %v815_v55 = vld [vmem:[#allocation5 + $0x318] sm:$0xff] }
  0x82   : > { %1789 = vmatpush1.bf16.msra.mxu0 %v1788_v35  ;;  %v1842_v35 = vpack.c.bf16 %v801_v30, %v797_v29  ;;  %v819_v56 = vld [vmem:[#allocation5 + $0x338] sm:$0xff]  ;;  %v1880_v58 = vpack.c.bf16 %v810_v52, %v806_v50  ;;  %v814_v62 = vld [vmem:[#allocation5 + $0x310] sm:$0xff]  ;;  %v825_v2 = vld [vmem:[#allocation5 + $0x368] sm:$0xff] }
  0x83   : > { %1821 = vmatpush1.bf16.msra.mxu1 %v1820_v36  ;;  %1791 = vmatprep.subr.bf16.mxu0 %v1790_v37  ;;  %v796_v36 = vld [vmem:[#allocation5 + $0x280] sm:$0xff]  ;;  %v1882_v63 = vpack.c.bf16 %v819_v56, %v815_v55  ;;  %v818_v0 = vld [vmem:[#allocation5 + $0x330] sm:$0xff]  ;;  %v823_v3 = vld [vmem:[#allocation5 + $0x358] sm:$0xff] }
  0x84   : > { %1823 = vmatprep.subr.bf16.mxu1 %v1822_v41  ;;  %v800_v37 = vld [vmem:[#allocation5 + $0x2a0] sm:$0xff]  ;;  %v805_v41 = vld [vmem:[#allocation5 + $0x2c8] sm:$0xff]  ;;  %v827_v4 = vld [vmem:[#allocation5 + $0x378] sm:$0xff]  ;;  %v1884_v6 = vpack.c.bf16 %v818_v0, %v814_v62 }
  0x85   : > { %v1844_v45 = vpack.c.bf16 %v800_v37, %v796_v36  ;;  %v822_v11 = vld [vmem:[#allocation5 + $0x350] sm:$0xff]  ;;  %v1886_v12 = vpack.c.bf16 %v827_v4, %v823_v3  ;;  %v833_v15 = vld [vmem:[#allocation5 + $0x3a8] sm:$0xff]  ;;  %v831_v16 = vld [vmem:[#allocation5 + $0x398] sm:$0xff] }
  0x86   : > { %1793 = vmatpush1.bf16.msra.mxu0 %v1792_v47  ;;  %v1846_v47 = vpack.c.bf16 %v809_v42, %v805_v41  ;;  %v826_v13 = vld [vmem:[#allocation5 + $0x370] sm:$0xff]  ;;  %v835_v17 = vld [vmem:[#allocation5 + $0x3b8] sm:$0xff]  ;;  %v837_v28 = vld [vmem:[#allocation5 + $0x3c8] sm:$0xff] }
  0x87   : > { %1825 = vmatpush1.bf16.msra.mxu1 %v1824_v48  ;;  %1795 = vmatprep.subr.bf16.mxu0 %v1794_v49  ;;  %v804_v48 = vld [vmem:[#allocation5 + $0x2c0] sm:$0xff]  ;;  %v1888_v19 = vpack.c.bf16 %v826_v13, %v822_v11  ;;  %v830_v24 = vld [vmem:[#allocation5 + $0x390] sm:$0xff]  ;;  %v841_v29 = vld [vmem:[#allocation5 + $0x3e8] sm:$0xff] }
  0x88   : > { %1827 = vmatprep.subr.bf16.mxu1 %v1826_v53  ;;  %v808_v49 = vld [vmem:[#allocation5 + $0x2e0] sm:$0xff]  ;;  %v813_v53 = vld [vmem:[#allocation5 + $0x308] sm:$0xff]  ;;  %v834_v26 = vld [vmem:[#allocation5 + $0x3b0] sm:$0xff]  ;;  %v1862_v30 = vpack.c.bf16 %v841_v29, %v837_v28 }
  0x89   : > { %v1848_v57 = vpack.c.bf16 %v808_v49, %v804_v48  ;;  %v839_v31 = vld [vmem:[#allocation5 + $0x3d8] sm:$0xff]  ;;  %v838_v36 = vld [vmem:[#allocation5 + $0x3d0] sm:$0xff]  ;;  %v716_v40 = vld [vmem:[#allocation3 + $0x208] sm:$0xff] }
  0x8a   : > { %1797 = vmatpush1.bf16.msra.mxu0 %v1796_v59  ;;  %v1850_v59 = vpack.c.bf16 %v817_v54, %v813_v53  ;;  %v843_v32 = vld [vmem:[#allocation5 + $0x3f8] sm:$0xff]  ;;  %v842_v37 = vld [vmem:[#allocation5 + $0x3f0] sm:$0xff]  ;;  %v720_v41 = vld [vmem:[#allocation3 + $0x228] sm:$0xff] }
  0x8b   : > { %1829 = vmatpush1.bf16.msra.mxu1 %v1828_v60  ;;  %1799 = vmatprep.subr.bf16.mxu0 %v1798_v61  ;;  %v812_v60 = vld [vmem:[#allocation5 + $0x300] sm:$0xff]  ;;  %v718_v42 = vld [vmem:[#allocation3 + $0x218] sm:$0xff]  ;;  %v1898_v43 = vpack.c.bf16 %v720_v41, %v716_v40  ;;  %v717_v49 = vld [vmem:[#allocation3 + $0x210] sm:$0xff] }
  0x8c   : > { %1831 = vmatprep.subr.bf16.mxu1 %v1830_v1  ;;  %v816_v61 = vld [vmem:[#allocation5 + $0x320] sm:$0xff]  ;;  %v821_v1 = vld [vmem:[#allocation5 + $0x348] sm:$0xff]  ;;  %v722_v44 = vld [vmem:[#allocation3 + $0x238] sm:$0xff] }
  0x8d   : > { %v1852_v5 = vpack.c.bf16 %v816_v61, %v812_v60  ;;  %v721_v50 = vld [vmem:[#allocation3 + $0x230] sm:$0xff]  ;;  %v724_v53 = vld [vmem:[#allocation3 + $0x248] sm:$0xff]  ;;  %v726_v55 = vld [vmem:[#allocation3 + $0x258] sm:$0xff] }
  0x8e   : > { %1801 = vmatpush1.bf16.msra.mxu0 %v1800_v7  ;;  %v1854_v7 = vpack.c.bf16 %v825_v2, %v821_v1  ;;  %v1932_v52 = vpack.c.bf16 %v721_v50, %v717_v49  ;;  %v728_v54 = vld [vmem:[#allocation3 + $0x268] sm:$0xff]  ;;  %v725_v62 = vld [vmem:[#allocation3 + $0x250] sm:$0xff]  ;;  %v734_v3 = vld [vmem:[#allocation3 + $0x298] sm:$0xff] }
  0x8f   : > { %1833 = vmatpush1.bf16.msra.mxu1 %v1832_v9  ;;  %1835 = vmatprep.subr.bf16.mxu0 %v1834_v10  ;;  %v820_v9 = vld [vmem:[#allocation5 + $0x340] sm:$0xff]  ;;  %v1902_v56 = vpack.c.bf16 %v728_v54, %v724_v53  ;;  %v732_v1 = vld [vmem:[#allocation3 + $0x288] sm:$0xff]  ;;  %v733_v11 = vld [vmem:[#allocation3 + $0x290] sm:$0xff] }
  0x90   : > { %1867 = vmatprep.subr.bf16.mxu1 %v1866_v14  ;;  %v824_v10 = vld [vmem:[#allocation5 + $0x360] sm:$0xff]  ;;  %v829_v14 = vld [vmem:[#allocation5 + $0x388] sm:$0xff]  ;;  %v750_v28 = vld [vmem:[#allocation3 + $0x318] sm:$0xff] }
  0x91   : > { %612 = vmatmul.mubr.f32.vlgmr.msra.gmra.mrb[0].mxu0 %v274_v20  ;;  %v1856_v18 = vpack.c.bf16 %v824_v10, %v820_v9  ;;  %v736_v2 = vld [vmem:[#allocation3 + $0x2a8] sm:$0xff]  ;;  %v758_v40 = vld [vmem:[#allocation3 + $0x358] sm:$0xff]  ;;  %v763_v54 = vld [vmem:[#allocation3 + $0x380] sm:$0xff] }
  0x92   : > { %683 = vmatmul.mubr.f32.vlgmr.msra.gmra.mrb[0].mxu1 %v274_v20  ;;  %1837 = vmatpush1.bf16.msra.mxu0 %v1836_v21  ;;  %v1858_v20 = vpack.c.bf16 %v833_v15, %v829_v14  ;;  %v1890_v21 = vpack.c.bf16 %v835_v17, %v831_v16  ;;  %v1906_v4 = vpack.c.bf16 %v736_v2, %v732_v1  ;;  %v740_v14 = vld [vmem:[#allocation3 + $0x2c8] sm:$0xff]  ;;  %v742_v16 = vld [vmem:[#allocation3 + $0x2d8] sm:$0xff]  ;;  %v771_v2 = vld [vmem:[#allocation3 + $0x3c0] sm:$0xff] }
  0x93   : > { %1869 = vmatpush1.bf16.msra.mxu1 %v1868_v22  ;;  %1839 = vmatprep.subr.bf16.mxu0 %v1838_v23  ;;  %v828_v22 = vld [vmem:[#allocation5 + $0x380] sm:$0xff]  ;;  %v744_v15 = vld [vmem:[#allocation3 + $0x2e8] sm:$0xff]  ;;  %v762_v41 = vld [vmem:[#allocation3 + $0x378] sm:$0xff] }
  0x94   : > { %1871 = vmatprep.subr.bf16.mxu1 %v1870_v27  ;;  %908 = vmatprep.mubr.f32.mxu0 %v2236_v8  ;;  %v832_v23 = vld [vmem:[#allocation5 + $0x3a0] sm:$0xff]  ;;  %v1892_v27 = vpack.c.bf16 %v834_v26, %v830_v24  ;;  %v1910_v17 = vpack.c.bf16 %v744_v15, %v740_v14  ;;  %v745_v24 = vld [vmem:[#allocation3 + $0x2f0] sm:$0xff]  ;;  %v748_v26 = vld [vmem:[#allocation3 + $0x308] sm:$0xff] }
  0x95   : > { %979 = vmatprep.mubr.f32.mxu1 %v2236_v8  ;;  %v1860_v25 = vpack.c.bf16 %v832_v23, %v828_v22  ;;  %v741_v23 = vld [vmem:[#allocation3 + $0x2d0] sm:$0xff]  ;;  %v768_v49 = vld [vmem:[#allocation3 + $0x3a8] sm:$0xff]  ;;  %v770_v53 = vld [vmem:[#allocation3 + $0x3b8] sm:$0xff] }
  0x96   : > { %1841 = vmatpush1.bf16.msra.mxu0 %v1840_v33  ;;  %v836_v33 = vld [vmem:[#allocation5 + $0x3c0] sm:$0xff]  ;;  %v1227_v15 = vld [vmem:[#allocation5 + $0x438] sm:$0xff] }
  0x97   : > { %1873 = vmatpush1.bf16.msra.mxu1 %v1872_v34  ;;  %1843 = vmatprep.subr.bf16.mxu0 %v1842_v35  ;;  %v1894_v34 = vpack.c.bf16 %v843_v32, %v839_v31  ;;  %v840_v35 = vld [vmem:[#allocation5 + $0x3e0] sm:$0xff] }
  0x98   : > { %1875 = vmatprep.subr.bf16.mxu1 %v1874_v39  ;;  %v1864_v38 = vpack.c.bf16 %v840_v35, %v836_v33  ;;  %v1896_v39 = vpack.c.bf16 %v842_v37, %v838_v36  ;;  %v747_v31 = vld [vmem:[#allocation3 + $0x300] sm:$0xff]  ;;  %v749_v35 = vld [vmem:[#allocation3 + $0x310] sm:$0xff]  ;;  %v756_v37 = vld [vmem:[#allocation3 + $0x348] sm:$0xff] }
  0x99   : > { %v751_v32 = vld [vmem:[#allocation3 + $0x320] sm:$0xff]  ;;  %v753_v36 = vld [vmem:[#allocation3 + $0x330] sm:$0xff] }
  0x9a   : > { %1845 = vmatpush1.bf16.msra.mxu0 %v1844_v45  ;;  %v715_v45 = vld [vmem:[#allocation3 + $0x200] sm:$0xff] }
  0x9b   : > { %1877 = vmatpush1.bf16.msra.mxu1 %v1876_v46  ;;  %1847 = vmatprep.subr.bf16.mxu0 %v1846_v47  ;;  %v719_v46 = vld [vmem:[#allocation3 + $0x220] sm:$0xff]  ;;  %v1930_v47 = vpack.c.bf16 %v722_v44, %v718_v42 }
  0x9c   : > { %1879 = vmatprep.subr.bf16.mxu1 %v1878_v51  ;;  %v1900_v48 = vpack.c.bf16 %v719_v46, %v715_v45  ;;  %v713_v51 = vld [vmem:[#allocation2 + $0x8] sm:$0xff]  ;;  %v755_v44 = vld [vmem:[#allocation3 + $0x340] sm:$0xff] }
  0x9d   : > { %v759_v45 = vld [vmem:[#allocation3 + $0x360] sm:$0xff]  ;;  %v757_v46 = vld [vmem:[#allocation3 + $0x350] sm:$0xff] }
  0x9e   : > { %1849 = vmatpush1.bf16.msra.mxu0 %v1848_v57  ;;  %v730_v57 = vld [vmem:[#allocation3 + $0x278] sm:$0xff]  ;;  %v1920_v50 = vpack.c.bf16 %v759_v45, %v755_v44  ;;  %v1233_v45 = vld [vmem:[#allocation5 + $0x468] sm:$0xff] }
  0x9f   : > { %1881 = vmatpush1.bf16.msra.mxu1 %v1880_v58  ;;  %1851 = vmatprep.subr.bf16.mxu0 %v1850_v59  ;;  %v723_v58 = vld [vmem:[#allocation3 + $0x240] sm:$0xff]  ;;  %v1934_v60 = vpack.c.bf16 %v730_v57, %v726_v55 }
  0xa0   : > { %1883 = vmatprep.subr.bf16.mxu1 %v1882_v63  ;;  %v727_v59 = vld [vmem:[#allocation3 + $0x260] sm:$0xff]  ;;  %v729_v63 = vld [vmem:[#allocation3 + $0x270] sm:$0xff] }
  0xa1   : > { %v1904_v61 = vpack.c.bf16 %v727_v59, %v723_v58  ;;  %v1936_v0 = vpack.c.bf16 %v729_v63, %v725_v62  ;;  %v767_v57 = vld [vmem:[#allocation3 + $0x3a0] sm:$0xff]  ;;  %v765_v58 = vld [vmem:[#allocation3 + $0x390] sm:$0xff]  ;;  %v774_v62 = vld [vmem:[#allocation3 + $0x3d8] sm:$0xff] }
  0xa2   : > { %1853 = vmatpush1.bf16.msra.mxu0 %v1852_v5  ;;  %v738_v5 = vld [vmem:[#allocation3 + $0x2b8] sm:$0xff]  ;;  %v769_v59 = vld [vmem:[#allocation3 + $0x3b0] sm:$0xff] }
  0xa3   : > { %1885 = vmatpush1.bf16.msra.mxu1 %v1884_v6  ;;  %1855 = vmatprep.subr.bf16.mxu0 %v1854_v7  ;;  %v731_v6 = vld [vmem:[#allocation3 + $0x280] sm:$0xff]  ;;  %v1938_v9 = vpack.c.bf16 %v738_v5, %v734_v3  ;;  %v778_v63 = vld [vmem:[#allocation3 + $0x3f8] sm:$0xff]  ;;  %v1956_v1 = vpack.c.bf16 %v769_v59, %v765_v58  ;;  %v1237_v58 = vld [vmem:[#allocation5 + $0x488] sm:$0xff] }
  0xa4   : > { %1887 = vmatprep.subr.bf16.mxu1 %v1886_v12  ;;  %v735_v7 = vld [vmem:[#allocation3 + $0x2a0] sm:$0xff]  ;;  %v737_v12 = vld [vmem:[#allocation3 + $0x2b0] sm:$0xff]  ;;  %v1241_v59 = vld [vmem:[#allocation5 + $0x4a8] sm:$0xff] }
  0xa5   : > { %v1908_v10 = vpack.c.bf16 %v735_v7, %v731_v6  ;;  %v1940_v13 = vpack.c.bf16 %v737_v12, %v733_v11  ;;  %v775_v5 = vld [vmem:[#allocation3 + $0x3e0] sm:$0xff]  ;;  %v773_v6 = vld [vmem:[#allocation3 + $0x3d0] sm:$0xff]  ;;  %v1221_v11 = vld [vmem:[#allocation5 + $0x408] sm:$0xff] }
  0xa6   : > { %1857 = vmatpush1.bf16.msra.mxu0 %v1856_v18  ;;  %v746_v18 = vld [vmem:[#allocation3 + $0x2f8] sm:$0xff]  ;;  %v777_v7 = vld [vmem:[#allocation3 + $0x3f0] sm:$0xff]  ;;  %v1225_v12 = vld [vmem:[#allocation5 + $0x428] sm:$0xff] }
  0xa7   : > { %1889 = vmatpush1.bf16.msra.mxu1 %v1888_v19  ;;  %1859 = vmatprep.subr.bf16.mxu0 %v1858_v20  ;;  %v739_v19 = vld [vmem:[#allocation3 + $0x2c0] sm:$0xff]  ;;  %v1962_v14 = vpack.c.bf16 %v1225_v12, %v1221_v11 }
  0xa8   : > { %1891 = vmatprep.subr.bf16.mxu1 %v1890_v21  ;;  %v743_v20 = vld [vmem:[#allocation3 + $0x2e0] sm:$0xff]  ;;  %v1942_v21 = vpack.c.bf16 %v746_v18, %v742_v16 }
  0xa9   : > { %v1912_v22 = vpack.c.bf16 %v743_v20, %v739_v19  ;;  %v692_v19 = vld [vmem:[%s2443_s4 + $0x18] sm:$0xff]  ;;  %v2392_v20 = vld [vmem:[%s262_s7] sm:$0xff] }
  0xaa   : > { %1861 = vmatpush1.bf16.msra.mxu0 %v1860_v25  ;;  %v1944_v25 = vpack.c.bf16 %v745_v24, %v741_v23 }
  0xab   : > { %1893 = vmatpush1.bf16.msra.mxu1 %v1892_v27  ;;  %1863 = vmatprep.subr.bf16.mxu0 %v1862_v30  ;;  %v752_v27 = vld [vmem:[#allocation3 + $0x328] sm:$0xff]  ;;  %v754_v30 = vld [vmem:[#allocation3 + $0x338] sm:$0xff] }
  0xac   : > { %1895 = vmatprep.subr.bf16.mxu1 %v1894_v34  ;;  %v1914_v29 = vpack.c.bf16 %v752_v27, %v748_v26  ;;  %v1946_v33 = vpack.c.bf16 %v754_v30, %v750_v28  ;;  %v1916_v34 = vpack.c.bf16 %v751_v32, %v747_v31  ;;  %v689_v30 = vld [vmem:[%s2443_s4] sm:$0xff] }
  0xae   : > { %1865 = vmatpush1.bf16.msra.mxu0 %v1864_v38  ;;  %v1948_v38 = vpack.c.bf16 %v753_v36, %v749_v35 }
  0xaf   : > { %1897 = vmatpush1.bf16.msra.mxu1 %v1896_v39  ;;  %1899 = vmatprep.subr.bf16.mxu0 %v1898_v43  ;;  %v760_v39 = vld [vmem:[#allocation3 + $0x368] sm:$0xff]  ;;  %v1950_v43 = vpack.c.bf16 %v762_v41, %v758_v40  ;;  %v1222_v41 = vld [vmem:[#allocation5 + $0x410] sm:$0xff] }
  0xb0   : > { %1931 = vmatprep.subr.bf16.mxu1 %v1930_v47  ;;  %v1918_v42 = vpack.c.bf16 %v760_v39, %v756_v37  ;;  %v761_v47 = vld [vmem:[#allocation3 + $0x370] sm:$0xff]  ;;  %v1220_v37 = vld [vmem:[#allocation5 + $0x400] sm:$0xff] }
  0xb1   : > { %909 = vmatmul.mubr.f32.vlgmr.msra.gmra.mrb[2].mxu0 %v713_v51 }
  0xb2   : > { %980 = vmatmul.mubr.f32.vlgmr.msra.gmra.mrb[2].mxu1 %v713_v51  ;;  %1901 = vmatpush1.bf16.msra.mxu0 %v1900_v48  ;;  %v764_v48 = vld [vmem:[#allocation3 + $0x388] sm:$0xff]  ;;  %v1952_v51 = vpack.c.bf16 %v761_v47, %v757_v46  ;;  %v1231_v46 = vld [vmem:[#allocation5 + $0x458] sm:$0xff] }
  0xb3   : > { %1933 = vmatpush1.bf16.msra.mxu1 %v1932_v52  ;;  %1903 = vmatprep.subr.bf16.mxu0 %v1902_v56  ;;  %v766_v52 = vld [vmem:[#allocation3 + $0x398] sm:$0xff]  ;;  %v1922_v55 = vpack.c.bf16 %v768_v49, %v764_v48 }
  0xb4   : > { %1050 = vmatprep.mubr.f32.mxu0 %v2236_v8  ;;  %1935 = vmatprep.subr.bf16.mxu1 %v1934_v60  ;;  %v1954_v56 = vpack.c.bf16 %v770_v53, %v766_v52  ;;  %v772_v60 = vld [vmem:[#allocation3 + $0x3c8] sm:$0xff]  ;;  %v1235_v47 = vld [vmem:[#allocation5 + $0x478] sm:$0xff]  ;;  %v1232_v52 = vld [vmem:[#allocation5 + $0x460] sm:$0xff] }
  0xb5   : > { %1121 = vmatprep.mubr.f32.mxu1 %v2236_v8 }
  0xb6   : > { %1905 = vmatpush1.bf16.msra.mxu0 %v1904_v61  ;;  %v776_v61 = vld [vmem:[#allocation3 + $0x3e8] sm:$0xff] }
  0xb7   : > { %1937 = vmatpush1.bf16.msra.mxu1 %v1936_v0  ;;  %1907 = vmatprep.subr.bf16.mxu0 %v1906_v4  ;;  %v1924_v0 = vpack.c.bf16 %v767_v57, %v763_v54  ;;  %v1926_v3 = vpack.c.bf16 %v776_v61, %v772_v60  ;;  %v1958_v4 = vpack.c.bf16 %v778_v63, %v774_v62  ;;  %v1234_v57 = vld [vmem:[#allocation5 + $0x470] sm:$0xff]  ;;  %v1239_v60 = vld [vmem:[#allocation5 + $0x498] sm:$0xff] }
  0xb8   : > { %1939 = vmatprep.subr.bf16.mxu1 %v1938_v9  ;;  %v1928_v9 = vpack.c.bf16 %v775_v5, %v771_v2  ;;  %v1243_v61 = vld [vmem:[#allocation5 + $0x4b8] sm:$0xff]  ;;  %v1970_v2 = vpack.c.bf16 %v1241_v59, %v1237_v58  ;;  %v1242_v5 = vld [vmem:[#allocation5 + $0x4b0] sm:$0xff]  ;;  %v1277_v58 = vld [vmem:[#allocation5 + $0x5c8] sm:$0xff] }
  0xb9   : > { %v1281_v59 = vld [vmem:[#allocation5 + $0x5e8] sm:$0xff] }
  0xba   : > { %1909 = vmatpush1.bf16.msra.mxu0 %v1908_v10  ;;  %v1960_v10 = vpack.c.bf16 %v777_v7, %v773_v6  ;;  %v1245_v6 = vld [vmem:[#allocation5 + $0x4c8] sm:$0xff] }
  0xbb   : > { %1941 = vmatpush1.bf16.msra.mxu1 %v1940_v13  ;;  %1911 = vmatprep.subr.bf16.mxu0 %v1910_v17  ;;  %v1223_v13 = vld [vmem:[#allocation5 + $0x418] sm:$0xff]  ;;  %v1249_v7 = vld [vmem:[#allocation5 + $0x4e8] sm:$0xff] }
  0xbc   : > { %1943 = vmatprep.subr.bf16.mxu1 %v1942_v21  ;;  %v1994_v16 = vpack.c.bf16 %v1227_v15, %v1223_v13  ;;  %v691_v17 = vld [vmem:[%s2443_s4 + $0x10] sm:$0xff]  ;;  %v1244_v13 = vld [vmem:[#allocation5 + $0x4c0] sm:$0xff]  ;;  %v1974_v15 = vpack.c.bf16 %v1249_v7, %v1245_v6  ;;  %v1156_v6 = vld [vmem:[#allocation3 + $0x408] sm:$0xff] }
  0xbd   : > { %v1160_v7 = vld [vmem:[#allocation3 + $0x428] sm:$0xff] }
  0xbe   : > { %1913 = vmatpush1.bf16.msra.mxu0 %v1912_v22 }
  0xbf   : > { %1945 = vmatpush1.bf16.msra.mxu1 %v1944_v25  ;;  %1915 = vmatprep.subr.bf16.mxu0 %v1914_v29  ;;  %v690_v29 = vld [vmem:[%s2443_s4 + $0x8] sm:$0xff] }
  0xc0   : > { %1947 = vmatprep.subr.bf16.mxu1 %v1946_v33 }
  0xc2   : > { %1917 = vmatpush1.bf16.msra.mxu0 %v1916_v34 }
  0xc3   : > { %1949 = vmatpush1.bf16.msra.mxu1 %v1948_v38  ;;  %1919 = vmatprep.subr.bf16.mxu0 %v1918_v42  ;;  %v1224_v38 = vld [vmem:[#allocation5 + $0x420] sm:$0xff]  ;;  %v1226_v42 = vld [vmem:[#allocation5 + $0x430] sm:$0xff] }
  0xc4   : > { %1951 = vmatprep.subr.bf16.mxu1 %v1950_v43  ;;  %v1229_v43 = vld [vmem:[#allocation5 + $0x448] sm:$0xff]  ;;  %v1964_v49 = vpack.c.bf16 %v1224_v38, %v1220_v37  ;;  %v1260_v38 = vld [vmem:[#allocation5 + $0x540] sm:$0xff] }
  0xc5   : > { %v1966_v54 = vpack.c.bf16 %v1233_v45, %v1229_v43  ;;  %v1266_v43 = vld [vmem:[#allocation5 + $0x570] sm:$0xff]  ;;  %v1273_v45 = vld [vmem:[#allocation5 + $0x5a8] sm:$0xff] }
  0xc6   : > { %1921 = vmatpush1.bf16.msra.mxu0 %v1920_v50  ;;  %v1996_v50 = vpack.c.bf16 %v1226_v42, %v1222_v41  ;;  %v1262_v42 = vld [vmem:[#allocation5 + $0x550] sm:$0xff] }
  0xc7   : > { %1953 = vmatpush1.bf16.msra.mxu1 %v1952_v51  ;;  %1923 = vmatprep.subr.bf16.mxu0 %v1922_v55  ;;  %v1228_v51 = vld [vmem:[#allocation5 + $0x440] sm:$0xff]  ;;  %v1998_v55 = vpack.c.bf16 %v1235_v47, %v1231_v46  ;;  %v1271_v46 = vld [vmem:[#allocation5 + $0x598] sm:$0xff] }
  0xc8   : > { %1955 = vmatprep.subr.bf16.mxu1 %v1954_v56  ;;  %v1230_v56 = vld [vmem:[#allocation5 + $0x450] sm:$0xff]  ;;  %v1968_v62 = vpack.c.bf16 %v1232_v52, %v1228_v51  ;;  %v1275_v47 = vld [vmem:[#allocation5 + $0x5b8] sm:$0xff]  ;;  %v1268_v52 = vld [vmem:[#allocation5 + $0x580] sm:$0xff] }
  0xc9   : > { %v2000_v63 = vpack.c.bf16 %v1234_v57, %v1230_v56  ;;  %v2018_v51 = vpack.c.bf16 %v1275_v47, %v1271_v46  ;;  %v1274_v56 = vld [vmem:[#allocation5 + $0x5b0] sm:$0xff]  ;;  %v1184_v46 = vld [vmem:[#allocation3 + $0x4e8] sm:$0xff]  ;;  %v1182_v47 = vld [vmem:[#allocation3 + $0x4d8] sm:$0xff] }
  0xca   : > { %1925 = vmatpush1.bf16.msra.mxu0 %v1924_v0  ;;  %v1236_v0 = vld [vmem:[#allocation5 + $0x480] sm:$0xff] }
  0xcb   : > { %1957 = vmatpush1.bf16.msra.mxu1 %v1956_v1  ;;  %1927 = vmatprep.subr.bf16.mxu0 %v1926_v3  ;;  %v1240_v1 = vld [vmem:[#allocation5 + $0x4a0] sm:$0xff]  ;;  %v2002_v3 = vpack.c.bf16 %v1243_v61, %v1239_v60  ;;  %v1990_v60 = vpack.c.bf16 %v1281_v59, %v1277_v58  ;;  %v1279_v61 = vld [vmem:[#allocation5 + $0x5d8] sm:$0xff] }
  0xcc   : > { %1959 = vmatprep.subr.bf16.mxu1 %v1958_v4  ;;  %v1238_v4 = vld [vmem:[#allocation5 + $0x490] sm:$0xff]  ;;  %v1972_v11 = vpack.c.bf16 %v1240_v1, %v1236_v0  ;;  %v1280_v1 = vld [vmem:[#allocation5 + $0x5e0] sm:$0xff]  ;;  %v1190_v58 = vld [vmem:[#allocation3 + $0x518] sm:$0xff] }
  0xcd   : > { %v2004_v12 = vpack.c.bf16 %v1242_v5, %v1238_v4 }
  0xce   : > { %1929 = vmatpush1.bf16.msra.mxu0 %v1928_v9  ;;  %v1247_v9 = vld [vmem:[#allocation5 + $0x4d8] sm:$0xff] }
  0xcf   : > { %1961 = vmatpush1.bf16.msra.mxu1 %v1960_v10  ;;  %1963 = vmatprep.subr.bf16.mxu0 %v1962_v14  ;;  %v1251_v10 = vld [vmem:[#allocation5 + $0x4f8] sm:$0xff]  ;;  %v1248_v14 = vld [vmem:[#allocation5 + $0x4e0] sm:$0xff] }
  0xd0   : > { %1995 = vmatprep.subr.bf16.mxu1 %v1994_v16  ;;  %v2006_v16 = vpack.c.bf16 %v1251_v10, %v1247_v9  ;;  %v1158_v9 = vld [vmem:[#allocation3 + $0x418] sm:$0xff]  ;;  %v2026_v10 = vpack.c.bf16 %v1160_v7, %v1156_v6 }
  0xd1   : > { %v1198_v6 = vld [vmem:[#allocation3 + $0x558] sm:$0xff] }
  0xd2   : > { %v1202_v7 = vld [vmem:[#allocation3 + $0x578] sm:$0xff] }
 0x164   : > { %v613_v18 = vpop.f32.mrb[0].mxu0 }
 0x165   : > { %v684_v21 = vpop.f32.mrb[0].mxu1  ;;  %v615_v22 = vpop.f32.mrb[1].mxu0  ;;  %v693_v33 = vadd.f32 %v689_v30, %v613_v18  ;;  %v1250_v18 = vld [vmem:[#allocation5 + $0x4f0] sm:$0xff] }
 0x166   : > { %v695_v23 = vadd.f32 %v691_v17, %v684_v21  ;;  %v686_v24 = vpop.f32.mrb[1].mxu1  ;;  %v694_v31 = vadd.f32 %v690_v29, %v615_v22  ;;  %v1246_v17 = vld [vmem:[#allocation5 + $0x4d0] sm:$0xff]  ;;  %v1257_v21 = vld [vmem:[#allocation5 + $0x528] sm:$0xff]  ;;  %v1255_v22 = vld [vmem:[#allocation5 + $0x518] sm:$0xff] }
 0x167   : > { %v696_v25 = vadd.f32 %v692_v19, %v686_v24  ;;  %v1253_v19 = vld [vmem:[#allocation5 + $0x508] sm:$0xff]  ;;  %v1976_v24 = vpack.c.bf16 %v1248_v14, %v1244_v13  ;;  %v1254_v30 = vld [vmem:[#allocation5 + $0x510] sm:$0xff]  ;;  %v1159_v13 = vld [vmem:[#allocation3 + $0x420] sm:$0xff] }
 0x168   : > { %v699_v26 = vmul.f32 %v695_v23, %v2392_v20  ;;  %v1259_v23 = vld [vmem:[#allocation5 + $0x538] sm:$0xff] }
 0x169   : > { %v2010_v29 = vpack.c.bf16 %v1259_v23, %v1255_v22  ;;  %v1168_v22 = vld [vmem:[#allocation3 + $0x468] sm:$0xff]  ;;  %v1166_v23 = vld [vmem:[#allocation3 + $0x458] sm:$0xff] }
 0x16a   : > { %v700_v27 = vadd.f32 %v699_v26, %v696_v25  ;;  %v2008_v25 = vpack.c.bf16 %v1250_v18, %v1246_v17  ;;  %v1252_v26 = vld [vmem:[#allocation5 + $0x500] sm:$0xff]  ;;  %v1161_v17 = vld [vmem:[#allocation3 + $0x430] sm:$0xff]  ;;  %v1153_v18 = vld [vmem:[#allocation2 + $0x10] sm:$0xff] }
 0x16c   : > { %v1693_v28 = vmul.f32 -1.442695, %v700_v27  ;;  %v1256_v27 = vld [vmem:[#allocation5 + $0x520] sm:$0xff] }
 0x16e   : > { %2135 = vpow2.f32 %v1693_v28  ;;  %v1978_v28 = vpack.c.bf16 %v1257_v21, %v1253_v19  ;;  %v1164_v21 = vld [vmem:[#allocation3 + $0x448] sm:$0xff] }
 0x16f   : > { %2137 = vtanh.f32 %v694_v31  ;;  %v1258_v31 = vld [vmem:[#allocation5 + $0x530] sm:$0xff] }
 0x170   : > { %v2012_v37 = vpack.c.bf16 %v1258_v31, %v1254_v30  ;;  %v1165_v30 = vld [vmem:[#allocation3 + $0x450] sm:$0xff] }
 0x171   : > { %v1169_v31 = vld [vmem:[#allocation3 + $0x470] sm:$0xff] }
 0x178   : > { %v2136_v32 = vpop.eup %2135 }
 0x179   : > { %v704_v34 = vadd.f32 1.0, %v2136_v32  ;;  %v2138_v35 = vpop.eup %2137  ;;  %v1261_v32 = vld [vmem:[#allocation5 + $0x548] sm:$0xff] }
 0x17b   : > { %2139 = vrcp.f32 %v704_v34  ;;  %v1263_v34 = vld [vmem:[#allocation5 + $0x558] sm:$0xff] }
 0x17c   : > { %2141 = vtanh.f32 %v693_v33  ;;  %v1265_v33 = vld [vmem:[#allocation5 + $0x568] sm:$0xff] }
 0x185   : > { %v2140_v36 = vpop.eup %2139 }
 0x186   : > { %v707_v39 = vsub.f32 1.0, %v2140_v36  ;;  %v709_v40 = vmul.f32 %v2140_v36, %v2138_v35  ;;  %v2142_v44 = vpop.eup %2141  ;;  %v1267_v35 = vld [vmem:[#allocation5 + $0x578] sm:$0xff]  ;;  %v1980_v36 = vpack.c.bf16 %v1256_v27, %v1252_v26  ;;  %v1163_v26 = vld [vmem:[#allocation3 + $0x440] sm:$0xff] }
 0x187   : > { %v2014_v41 = vpack.c.bf16 %v1267_v35, %v1263_v34  ;;  %v1167_v27 = vld [vmem:[#allocation3 + $0x460] sm:$0xff]  ;;  %v1176_v34 = vld [vmem:[#allocation3 + $0x4a8] sm:$0xff]  ;;  %v1174_v35 = vld [vmem:[#allocation3 + $0x498] sm:$0xff] }
 0x188   : > { %v708_v48 = vmul.f32 %v2142_v44, %v707_v39  ;;  %v1264_v39 = vld [vmem:[#allocation5 + $0x560] sm:$0xff]  ;;  %v1269_v44 = vld [vmem:[#allocation5 + $0x588] sm:$0xff] }
 0x18a   : > { %v710_v53 = vadd.f32 %v709_v40, %v708_v48  ;;  %v1982_v40 = vpack.c.bf16 %v1265_v33, %v1261_v32  ;;  %v1984_v48 = vpack.c.bf16 %v1264_v39, %v1260_v38  ;;  %v2064_v32 = vpack.c.bf16 %v1169_v31, %v1165_v30  ;;  %v1172_v33 = vld [vmem:[#allocation3 + $0x488] sm:$0xff]  ;;  %v1171_v38 = vld [vmem:[#allocation3 + $0x480] sm:$0xff]  ;;  %v1214_v30 = vld [vmem:[#allocation3 + $0x5d8] sm:$0xff] }
 0x18b   : > { %v1175_v39 = vld [vmem:[#allocation3 + $0x4a0] sm:$0xff]  ;;  %v1218_v31 = vld [vmem:[#allocation3 + $0x5f8] sm:$0xff] }
 0x18c   : > { %711 = vst [vmem:[#allocation2] sm:$0xff] %v710_v53  ;;  %1051 = vmatmul.mubr.f32.vlgmr.msra.gmra.mrb[2].mxu0 %v710_v53  ;;  %1122 = vmatmul.mubr.f32.vlgmr.msra.gmra.mrb[2].mxu1 %v710_v53  ;;  %v1272_v53 = vld [vmem:[#allocation5 + $0x5a0] sm:$0xff] }
 0x18d   : > { %1965 = vmatpush1.bf16.msra.mxu0 %v1964_v49  ;;  %1997 = vmatpush1.bf16.msra.mxu1 %v1996_v50  ;;  %v2016_v49 = vpack.c.bf16 %v1266_v43, %v1262_v42  ;;  %v1986_v50 = vpack.c.bf16 %v1273_v45, %v1269_v44  ;;  %v1173_v42 = vld [vmem:[#allocation3 + $0x490] sm:$0xff]  ;;  %v1180_v45 = vld [vmem:[#allocation3 + $0x4c8] sm:$0xff] }
 0x18e   : > { %1967 = vmatprep.subr.bf16.mxu0 %v1966_v54  ;;  %1999 = vmatprep.subr.bf16.mxu1 %v1998_v55  ;;  %v1270_v54 = vld [vmem:[#allocation5 + $0x590] sm:$0xff]  ;;  %v1988_v55 = vpack.c.bf16 %v1272_v53, %v1268_v52 }
 0x18f   : > { %1348 = vmatprep.mubr.f32.mxu0 %v2236_v8  ;;  %1419 = vmatprep.mubr.f32.mxu1 %v2236_v8  ;;  %v2020_v57 = vpack.c.bf16 %v1274_v56, %v1270_v54  ;;  %v1177_v43 = vld [vmem:[#allocation3 + $0x4b0] sm:$0xff]  ;;  %v1188_v56 = vld [vmem:[#allocation3 + $0x508] sm:$0xff] }
 0x190   : > { %v2068_v44 = vpack.c.bf16 %v1177_v43, %v1173_v42  ;;  %v1181_v53 = vld [vmem:[#allocation3 + $0x4d0] sm:$0xff]  ;;  %v1696_v42 = vld [vmem:[%s2443_s4 + $0x30] sm:$0xff]  ;;  %v1697_v43 = vld [vmem:[%s2443_s4 + $0x38] sm:$0xff] }
 0x191   : > { %1969 = vmatpush1.bf16.msra.mxu0 %v1968_v62  ;;  %2001 = vmatpush1.bf16.msra.mxu1 %v2000_v63  ;;  %v1283_v62 = vld [vmem:[#allocation5 + $0x5f8] sm:$0xff]  ;;  %v1276_v63 = vld [vmem:[#allocation5 + $0x5c0] sm:$0xff]  ;;  %v1185_v54 = vld [vmem:[#allocation3 + $0x4f0] sm:$0xff] }
 0x192   : > { %1971 = vmatprep.subr.bf16.mxu0 %v1970_v2  ;;  %2003 = vmatprep.subr.bf16.mxu1 %v2002_v3  ;;  %v2022_v0 = vpack.c.bf16 %v1283_v62, %v1279_v61  ;;  %v1278_v2 = vld [vmem:[#allocation5 + $0x5d0] sm:$0xff]  ;;  %v1992_v4 = vpack.c.bf16 %v1280_v1, %v1276_v63  ;;  %v1187_v61 = vld [vmem:[#allocation3 + $0x500] sm:$0xff] }
 0x193   : > { %v1282_v3 = vld [vmem:[#allocation5 + $0x5f0] sm:$0xff]  ;;  %v1191_v62 = vld [vmem:[#allocation3 + $0x520] sm:$0xff] }
 0x194   : > { %v2024_v5 = vpack.c.bf16 %v1282_v3, %v1278_v2  ;;  %v1189_v1 = vld [vmem:[#allocation3 + $0x510] sm:$0xff]  ;;  %v1196_v3 = vld [vmem:[#allocation3 + $0x548] sm:$0xff] }
 0x195   : > { %1973 = vmatpush1.bf16.msra.mxu0 %v1972_v11  ;;  %2005 = vmatpush1.bf16.msra.mxu1 %v2004_v12  ;;  %v1162_v11 = vld [vmem:[#allocation3 + $0x438] sm:$0xff]  ;;  %v1155_v12 = vld [vmem:[#allocation3 + $0x400] sm:$0xff]  ;;  %v1193_v2 = vld [vmem:[#allocation3 + $0x530] sm:$0xff] }
 0x196   : > { %1975 = vmatprep.subr.bf16.mxu0 %v1974_v15  ;;  %2007 = vmatprep.subr.bf16.mxu1 %v2006_v16  ;;  %v2058_v14 = vpack.c.bf16 %v1162_v11, %v1158_v9  ;;  %v2028_v15 = vpack.c.bf16 %v1159_v13, %v1155_v12  ;;  %v1157_v16 = vld [vmem:[#allocation3 + $0x410] sm:$0xff]  ;;  %v1195_v11 = vld [vmem:[#allocation3 + $0x540] sm:$0xff] }
 0x197   : > { %v2060_v19 = vpack.c.bf16 %v1161_v17, %v1157_v16  ;;  %v1199_v12 = vld [vmem:[#allocation3 + $0x560] sm:$0xff]  ;;  %v1197_v13 = vld [vmem:[#allocation3 + $0x550] sm:$0xff]  ;;  %v1208_v16 = vld [vmem:[#allocation3 + $0x5a8] sm:$0xff] }
 0x198   : > { %v2048_v17 = vpack.c.bf16 %v1199_v12, %v1195_v11 }
 0x199   : > { %1977 = vmatpush1.bf16.msra.mxu0 %v1976_v24  ;;  %2009 = vmatpush1.bf16.msra.mxu1 %v2008_v25  ;;  %v2030_v24 = vpack.c.bf16 %v1168_v22, %v1164_v21  ;;  %v1170_v25 = vld [vmem:[#allocation3 + $0x478] sm:$0xff]  ;;  %v1203_v22 = vld [vmem:[#allocation3 + $0x580] sm:$0xff] }
 0x19a   : > { %1979 = vmatprep.subr.bf16.mxu0 %v1978_v28  ;;  %2011 = vmatprep.subr.bf16.mxu1 %v2010_v29  ;;  %v2062_v28 = vpack.c.bf16 %v1170_v25, %v1166_v23  ;;  %v2032_v29 = vpack.c.bf16 %v1167_v27, %v1163_v26  ;;  %v1210_v21 = vld [vmem:[#allocation3 + $0x5b8] sm:$0xff]  ;;  %v1207_v25 = vld [vmem:[#allocation3 + $0x5a0] sm:$0xff]  ;;  %v1205_v26 = vld [vmem:[#allocation3 + $0x590] sm:$0xff] }
 0x19b   : > { %v1209_v27 = vld [vmem:[#allocation3 + $0x5b0] sm:$0xff] }
 0x19d   : > { %1981 = vmatpush1.bf16.msra.mxu0 %v1980_v36  ;;  %2013 = vmatpush1.bf16.msra.mxu1 %v2012_v37  ;;  %v2034_v36 = vpack.c.bf16 %v1176_v34, %v1172_v33  ;;  %v1178_v37 = vld [vmem:[#allocation3 + $0x4b8] sm:$0xff]  ;;  %v2084_v33 = vpack.c.bf16 %v1209_v27, %v1205_v26  ;;  %v1211_v34 = vld [vmem:[#allocation3 + $0x5c0] sm:$0xff] }
 0x19e   : > { %1983 = vmatprep.subr.bf16.mxu0 %v1982_v40  ;;  %2015 = vmatprep.subr.bf16.mxu1 %v2014_v41  ;;  %v2066_v40 = vpack.c.bf16 %v1178_v37, %v1174_v35  ;;  %v2036_v41 = vpack.c.bf16 %v1175_v39, %v1171_v38  ;;  %v1215_v37 = vld [vmem:[#allocation3 + $0x5e0] sm:$0xff]  ;;  %v1213_v38 = vld [vmem:[#allocation3 + $0x5d0] sm:$0xff] }
 0x19f   : > { %v1217_v39 = vld [vmem:[#allocation3 + $0x5f0] sm:$0xff] }
 0x1a1   : > { %1985 = vmatpush1.bf16.msra.mxu0 %v1984_v48  ;;  %2017 = vmatpush1.bf16.msra.mxu1 %v2016_v49  ;;  %v2038_v48 = vpack.c.bf16 %v1184_v46, %v1180_v45  ;;  %v1186_v49 = vld [vmem:[#allocation3 + $0x4f8] sm:$0xff] }
 0x1a2   : > { %1987 = vmatprep.subr.bf16.mxu0 %v1986_v50  ;;  %2019 = vmatprep.subr.bf16.mxu1 %v2018_v51  ;;  %v1179_v50 = vld [vmem:[#allocation3 + $0x4c0] sm:$0xff]  ;;  %v2070_v51 = vpack.c.bf16 %v1186_v49, %v1182_v47 }
 0x1a5   : > { %1989 = vmatpush1.bf16.msra.mxu0 %v1988_v55  ;;  %2021 = vmatpush1.bf16.msra.mxu1 %v2020_v57  ;;  %v2072_v55 = vpack.c.bf16 %v1185_v54, %v1181_v53  ;;  %v1192_v57 = vld [vmem:[#allocation3 + $0x528] sm:$0xff] }
 0x1a6   : > { %1991 = vmatprep.subr.bf16.mxu0 %v1990_v60  ;;  %2023 = vmatprep.subr.bf16.mxu1 %v2022_v0  ;;  %v2042_v59 = vpack.c.bf16 %v1192_v57, %v1188_v56  ;;  %v1194_v60 = vld [vmem:[#allocation3 + $0x538] sm:$0xff]  ;;  %v2044_v0 = vpack.c.bf16 %v1191_v62, %v1187_v61  ;;  %v1694_v53 = vld [vmem:[%s2443_s4 + $0x20] sm:$0xff] }
 0x1a7   : > { %v2074_v63 = vpack.c.bf16 %v1194_v60, %v1190_v58 }
 0x1a9   : > { %1993 = vmatpush1.bf16.msra.mxu0 %v1992_v4  ;;  %2025 = vmatpush1.bf16.msra.mxu1 %v2024_v5  ;;  %v2076_v4 = vpack.c.bf16 %v1193_v2, %v1189_v1  ;;  %v1200_v5 = vld [vmem:[#allocation3 + $0x568] sm:$0xff]  ;;  %v1701_v1 = vld [vmem:[%s2443_s4 + $0x50] sm:$0xff]  ;;  %v1702_v2 = vld [vmem:[%s2443_s4 + $0x58] sm:$0xff] }
 0x1aa   : > { %2027 = vmatprep.subr.bf16.mxu0 %v2026_v10  ;;  %2059 = vmatprep.subr.bf16.mxu1 %v2058_v14  ;;  %v2046_v9 = vpack.c.bf16 %v1200_v5, %v1196_v3  ;;  %v2078_v10 = vpack.c.bf16 %v1202_v7, %v1198_v6  ;;  %v1201_v14 = vld [vmem:[#allocation3 + $0x570] sm:$0xff] }
 0x1ac   : > { %1349 = vmatmul.mubr.f32.vlgmr.msra.gmra.mrb[4].mxu0 %v1153_v18  ;;  %1420 = vmatmul.mubr.f32.vlgmr.msra.gmra.mrb[4].mxu1 %v1153_v18  ;;  %v2080_v18 = vpack.c.bf16 %v1201_v14, %v1197_v13  ;;  %v1700_v13 = vld [vmem:[%s2443_s4 + $0x48] sm:$0xff]  ;;  %v1699_v14 = vld [vmem:[%s2443_s4 + $0x40] sm:$0xff] }
 0x1ad   : > { %2029 = vmatpush1.bf16.msra.mxu0 %v2028_v15  ;;  %2061 = vmatpush1.bf16.msra.mxu1 %v2060_v19  ;;  %v1204_v15 = vld [vmem:[#allocation3 + $0x588] sm:$0xff]  ;;  %v1206_v19 = vld [vmem:[#allocation3 + $0x598] sm:$0xff] }
 0x1ae   : > { %2031 = vmatprep.subr.bf16.mxu0 %v2030_v24  ;;  %1490 = vmatprep.mubr.f32.mxu0 %v2236_v8  ;;  %v2050_v23 = vpack.c.bf16 %v1208_v16, %v1204_v15  ;;  %v2082_v24 = vpack.c.bf16 %v1210_v21, %v1206_v19 }
 0x1af   : > { %2063 = vmatprep.subr.bf16.mxu1 %v2062_v28  ;;  %1561 = vmatprep.mubr.f32.mxu1 %v2236_v8  ;;  %v1183_v8 = vld [vmem:[#allocation3 + $0x4e0] sm:$0xff]  ;;  %v1212_v28 = vld [vmem:[#allocation3 + $0x5c8] sm:$0xff] }
 0x1b0   : > { %v2040_v52 = vpack.c.bf16 %v1183_v8, %v1179_v50 }
 0x1b1   : > { %2033 = vmatpush1.bf16.msra.mxu0 %v2032_v29  ;;  %2065 = vmatpush1.bf16.msra.mxu1 %v2064_v32  ;;  %v1216_v29 = vld [vmem:[#allocation3 + $0x5e8] sm:$0xff]  ;;  %v2052_v32 = vpack.c.bf16 %v1207_v25, %v1203_v22 }
 0x1b2   : > { %2035 = vmatprep.subr.bf16.mxu0 %v2034_v36  ;;  %2067 = vmatprep.subr.bf16.mxu1 %v2066_v40  ;;  %v2054_v35 = vpack.c.bf16 %v1216_v29, %v1212_v28  ;;  %v2086_v36 = vpack.c.bf16 %v1218_v31, %v1214_v30  ;;  %v2056_v40 = vpack.c.bf16 %v1215_v37, %v1211_v34 }
 0x1b5   : > { %2037 = vmatpush1.bf16.msra.mxu0 %v2036_v41  ;;  %2069 = vmatpush1.bf16.msra.mxu1 %v2068_v44  ;;  %v2088_v41 = vpack.c.bf16 %v1217_v39, %v1213_v38 }
 0x1b6   : > { %2039 = vmatprep.subr.bf16.mxu0 %v2038_v48  ;;  %2071 = vmatprep.subr.bf16.mxu1 %v2070_v51 }
 0x1b9   : > { %2041 = vmatpush1.bf16.msra.mxu0 %v2040_v52  ;;  %2073 = vmatpush1.bf16.msra.mxu1 %v2072_v55  ;;  %v1695_v52 = vld [vmem:[%s2443_s4 + $0x28] sm:$0xff] }
 0x1ba   : > { %2043 = vmatprep.subr.bf16.mxu0 %v2042_v59  ;;  %2075 = vmatprep.subr.bf16.mxu1 %v2074_v63 }
 0x1bd   : > { %2045 = vmatpush1.bf16.msra.mxu0 %v2044_v0  ;;  %2077 = vmatpush1.bf16.msra.mxu1 %v2076_v4 }
 0x1be   : > { %2047 = vmatprep.subr.bf16.mxu0 %v2046_v9  ;;  %2079 = vmatprep.subr.bf16.mxu1 %v2078_v10 }
 0x1c1   : > { %2049 = vmatpush1.bf16.msra.mxu0 %v2048_v17  ;;  %2081 = vmatpush1.bf16.msra.mxu1 %v2080_v18 }
 0x1c2   : > { %2051 = vmatprep.subr.bf16.mxu0 %v2050_v23  ;;  %2083 = vmatprep.subr.bf16.mxu1 %v2082_v24 }
 0x1c5   : > { %2053 = vmatpush1.bf16.msra.mxu0 %v2052_v32  ;;  %2085 = vmatpush1.bf16.msra.mxu1 %v2084_v33 }
 0x1c6   : > { %2055 = vmatprep.subr.bf16.mxu0 %v2054_v35  ;;  %2087 = vmatprep.subr.bf16.mxu1 %v2086_v36 }
 0x1c9   : > { %2057 = vmatpush1.bf16.msra.mxu0 %v2056_v40  ;;  %2089 = vmatpush1.bf16.msra.mxu1 %v2088_v41 }
 0x25f   : > { %v1052_v44 = vpop.f32.mrb[2].mxu0  ;;  %v1123_v45 = vpop.f32.mrb[2].mxu1 }
 0x260   : > { %v1135_v46 = vadd.f32 %v1696_v42, %v1123_v45  ;;  %v1054_v47 = vpop.f32.mrb[3].mxu0  ;;  %v1125_v48 = vpop.f32.mrb[3].mxu1  ;;  %v1133_v56 = vadd.f32 %v1694_v53, %v1052_v44 }
 0x261   : > { %v1136_v49 = vadd.f32 %v1697_v43, %v1125_v48  ;;  %v1134_v54 = vadd.f32 %v1695_v52, %v1054_v47 }
 0x262   : > { %v1139_v50 = vmul.f32 %v1135_v46, %v2392_v20 }
 0x264   : > { %v1140_v8 = vadd.f32 %v1139_v50, %v1136_v49 }
 0x266   : > { %v1698_v51 = vmul.f32 -1.442695, %v1140_v8 }
 0x268   : > { %2143 = vpow2.f32 %v1698_v51 }
 0x269   : > { %2145 = vtanh.f32 %v1134_v54 }
 0x272   : > { %v2144_v55 = vpop.eup %2143 }
 0x273   : > { %v1144_v57 = vadd.f32 1.0, %v2144_v55  ;;  %v2146_v58 = vpop.eup %2145 }
 0x275   : > { %2147 = vrcp.f32 %v1144_v57 }
 0x276   : > { %2149 = vtanh.f32 %v1133_v56 }
 0x27f   : > { %v2148_v59 = vpop.eup %2147 }
 0x280   : > { %v1147_v60 = vsub.f32 1.0, %v2148_v59  ;;  %v1149_v61 = vmul.f32 %v2148_v59, %v2146_v58  ;;  %v2150_v62 = vpop.eup %2149 }
 0x282   : > { %v1148_v63 = vmul.f32 %v2150_v62, %v1147_v60 }
 0x284   : > { %v1150_v0 = vadd.f32 %v1149_v61, %v1148_v63 }
 0x286   : > { %1151 = vst [vmem:[#allocation2 + $0x8] sm:$0xff] %v1150_v0  ;;  %1491 = vmatmul.mubr.f32.vlgmr.msra.gmra.mrb[4].mxu0 %v1150_v0  ;;  %1562 = vmatmul.mubr.f32.vlgmr.msra.gmra.mrb[4].mxu1 %v1150_v0 }
 0x359   : > { %v1492_v3 = vpop.f32.mrb[4].mxu0  ;;  %v1563_v4 = vpop.f32.mrb[4].mxu1 }
 0x35a   : > { %v1575_v5 = vadd.f32 %v1701_v1, %v1563_v4  ;;  %v1494_v6 = vpop.f32.mrb[5].mxu0  ;;  %v1565_v7 = vpop.f32.mrb[5].mxu1  ;;  %v1573_v17 = vadd.f32 %v1699_v14, %v1492_v3 }
 0x35b   : > { %v1576_v9 = vadd.f32 %v1702_v2, %v1565_v7  ;;  %v1574_v15 = vadd.f32 %v1700_v13, %v1494_v6 }
 0x35c   : > { %v1579_v10 = vmul.f32 %v1575_v5, %v2392_v20 }
 0x35e   : > { %v1580_v11 = vadd.f32 %v1579_v10, %v1576_v9 }
 0x360   : > { %v1703_v12 = vmul.f32 -1.442695, %v1580_v11 }
 0x362   : > { %2151 = vpow2.f32 %v1703_v12 }
 0x363   : > { %2153 = vtanh.f32 %v1574_v15 }
 0x36c   : > { %v2152_v16 = vpop.eup %2151 }
 0x36d   : > { %v1584_v18 = vadd.f32 1.0, %v2152_v16  ;;  %v2154_v20 = vpop.eup %2153 }
 0x36f   : > { %2155 = vrcp.f32 %v1584_v18 }
 0x370   : > { %2157 = vtanh.f32 %v1573_v17 }
 0x379   : > { %v2156_v19 = vpop.eup %2155 }
 0x37a   : > { %v1587_v21 = vsub.f32 1.0, %v2156_v19  ;;  %v1589_v22 = vmul.f32 %v2156_v19, %v2154_v20  ;;  %v2158_v23 = vpop.eup %2157 }
 0x37c   : > { %v1588_v24 = vmul.f32 %v2158_v23, %v1587_v21 }
 0x37e   : > { %v1590_v25 = vadd.f32 %v1589_v22, %v1588_v24 }
 0x380   : > { %1591 = vst [vmem:[#allocation2 + $0x10] sm:$0xff] %v1590_v25  ;;  %1592 = vst [vmem:[%s266_s10] sm:$0xff] %v1590_v25 }
 0x381 PF: > { %s17_s18 = sadd.s32 1, %s2229_s18  }
 0x382   : > { %p14_p10 = scmp.ge.s32.totalorder %s17_s18, 10  }
 0x384   :  { %16 = sbr.rel (!%p14_p10) target bundleno = 2 (0x2), region = 94 }
 0x38b   :  { %1612 = vsyncpa [#allocation4], 1 }
 0x38c   :  { %1614 = vsyncpa [#allocation4 + $0x1], 1 }
 0x38d   :  { %1615 = vsyncpa [#allocation6], 1 }

</bundles_post_ra>
